<compile_context>
chip_gen: v7x
topology: tpu7x:2x2x1
jax: 0.10.0
libtpu: 0.0.40
codegen_flags: <defaults>
</compile_context>

<pallas_src>
from dataclasses import dataclass
from typing import Optional, Tuple
import functools

import numpy as np
import jax
import jax.numpy as jnp
from jax.experimental import pallas as pl
from jax.experimental.pallas import tpu as pltpu


@dataclass
class MultiscaleSpectralLossConfig:
    block_widths: Tuple[int, ...] = (8, 16, 32, 64)
    block_overlap: int = 8
    mel_bands: Optional[int] = None
    freq_range: Tuple[float, float] = (20, 20000)
    sample_rate: int = 32000
    stereo_weight: float = 0.5


def _round_up(x: int, m: int) -> int:
    return ((x + m - 1) // m) * m


# ---------------------------------------------------------------------------
# deterministic "parameters": periodic Hann window baked into a fused windowed
# one-sided DFT basis of shape (2*Kpad, W): rows [0,K) = w*cos, rows [Kpad,Kpad+K)
# = -w*sin, remaining rows zero (sublane padding; contributes 0 to the loss).
# ---------------------------------------------------------------------------
def _hann_window(W: int) -> np.ndarray:
    # torch.hann_window default is periodic=True
    n = np.arange(W)
    return 0.5 - 0.5 * np.cos(2.0 * np.pi * n / W)


def _fused_basis(W: int):
    K = W // 2 + 1
    Kpad = _round_up(K, 8)
    n = np.arange(W)[None, :].astype(np.float64)
    k = np.arange(K)[:, None].astype(np.float64)
    ang = 2.0 * np.pi * k * n / W
    w = _hann_window(W)[None, :].astype(np.float64)
    cb = np.zeros((2 * Kpad, W), dtype=np.float32)
    cb[:K, :] = (w * np.cos(ang)).astype(np.float32)
    cb[Kpad:Kpad + K, :] = (-(w * np.sin(ang))).astype(np.float32)
    return jnp.asarray(cb), K, Kpad


# ---------------------------------------------------------------------------
# STFT framing glue (torch.stft(center=True, pad_mode='constant') semantics),
# built DIRECTLY in the transposed lane-dense layout (C, W, T*B) via W
# hop-strided slices (no gather, no transpose of the 8x-duplicated array).
# Row ordering within the last axis is irrelevant: the kernel only sums over it.
# ---------------------------------------------------------------------------
def _frames_t(sig: jnp.ndarray, W: int, hop: int):
    """sig: (C, B, L) -> frames (C, W, T*B), T = 1 + L//hop."""
    C, B, L = sig.shape
    pad = W // 2
    padded = jnp.pad(sig, ((0, 0), (0, 0), (pad, pad)))          # (C, B, L + W)
    T = 1 + L // hop
    pt = jnp.transpose(padded, (0, 2, 1))                        # (C, Lpad, B)
    stop = (T - 1) * hop + 1
    cols = [pt[:, w:w + stop:hop, :] for w in range(W)]          # W x (C, T, B)
    fr = jnp.stack(cols, axis=1)                                 # (C, W, T, B)
    return fr.reshape(C, W, T * B), T


# ---------------------------------------------------------------------------
# Pallas kernel: per (channel, row-tile) grid step, two MXU dots produce the
# fused real/imag spectra of x and y, the VPU accumulates |log1p|x|-log1p|y||
# into a VMEM scratch, and a single XLU reduction / store happens per channel
# at the last row tile.
# ---------------------------------------------------------------------------
def _stft_l1_kernel(fx_ref, fy_ref, cb_ref, out_ref, acc_ref):
    i = pl.program_id(1)

    @pl.when(i == 0)
    def _():
        acc_ref[...] = jnp.zeros_like(acc_ref)

    fx = fx_ref[0]                          # (W, TM) lane-dense frame tile (x)
    fy = fy_ref[0]                          # (W, TM) lane-dense frame tile (y)
    cb = cb_ref[...]                        # (2*Kpad, W) fused [cos ; -sin] basis
    kp = cb.shape[0] // 2

    # (2*Kpad, W) @ (W, TM) -> (2*Kpad, TM), lane-dense; sublane slices at kp
    # (multiple of 8) are tile-aligned and free.
    rx = jnp.dot(cb, fx, preferred_element_type=jnp.float32)
    ry = jnp.dot(cb, fy, preferred_element_type=jnp.float32)

    x_mag = jnp.sqrt(rx[:kp] * rx[:kp] + rx[kp:] * rx[kp:])
    y_mag = jnp.sqrt(ry[:kp] * ry[:kp] + ry[kp:] * ry[kp:])
    acc_ref[...] += jnp.abs(jnp.log1p(x_mag) - jnp.log1p(y_mag))

    @pl.when(i == pl.num_programs(1) - 1)
    def _():
        out_ref[...] = jnp.broadcast_to(jnp.sum(acc_ref[...]), out_ref.shape)


def _stft_l1_sums(fx: jnp.ndarray, fy: jnp.ndarray, cb: jnp.ndarray,
                  kpad: int, tm: int = 2048) -> jnp.ndarray:
    """fx, fy: (C, W, rows) transposed frames.  Returns per-channel abs-diff sums (C,)."""
    C, W, rows = fx.shape
    tm_eff = min(tm, _round_up(rows, 128))          # shrink tile for tiny inputs
    rows_p = _round_up(rows, tm_eff)
    if rows_p != rows:                              # zero frames contribute 0
        padc = ((0, 0), (0, 0), (0, rows_p - rows))
        fx = jnp.pad(fx, padc)
        fy = jnp.pad(fy, padc)
    n_tiles = rows_p // tm_eff

    out = pl.pallas_call(
        _stft_l1_kernel,
        out_shape=jax.ShapeDtypeStruct((C, 8, 128), jnp.float32),
        grid_spec=pltpu.PrefetchScalarGridSpec(
            num_scalar_prefetch=0,
            grid=(C, n_tiles),
            in_specs=[
                pl.BlockSpec((1, W, tm_eff), lambda c, i: (c, 0, i)),
                pl.BlockSpec((1, W, tm_eff), lambda c, i: (c, 0, i)),
                pl.BlockSpec((2 * kpad, W), lambda c, i: (0, 0)),
            ],
            out_specs=pl.BlockSpec((1, 8, 128), lambda c, i: (c, 0, 0)),
            scratch_shapes=[pltpu.VMEM((kpad, tm_eff), jnp.float32)],
        ),
        compiler_params=pltpu.CompilerParams(
            dimension_semantics=("parallel", "arbitrary")),
    )(fx, fy, cb)
    return out[:, 0, 0]                              # (C,)


# ---------------------------------------------------------------------------
# Forward (matches MultiscaleSpectralLoss.forward)
# ---------------------------------------------------------------------------
def multiscale_spectral_loss(x: jnp.ndarray, y: jnp.ndarray,
                             config: MultiscaleSpectralLossConfig) -> jnp.ndarray:
    if x.shape != y.shape:
        raise ValueError(f"Shape mismatch: {x.shape} vs {y.shape}")
    B, C, F, T = x.shape
    L = F * T

    # (B, C, F, T) -> per-channel flattened signals, channel-major: (C, B, L)
    x_sig = jnp.transpose(x, (1, 0, 2, 3)).reshape(C, B, L).astype(jnp.float32)
    y_sig = jnp.transpose(y, (1, 0, 2, 3)).reshape(C, B, L).astype(jnp.float32)

    ch_w = np.ones((C,), np.float32)
    if C > 1:
        ch_w[1] = config.stereo_weight                 # stereo_weight on channel 1
    ch_w = jnp.asarray(ch_w)

    total = jnp.float32(0.0)
    for W in config.block_widths:
        hop = W // config.block_overlap
        cb, K, Kpad = _fused_basis(W)
        fx, Tf = _frames_t(x_sig, W, hop)              # (C, W, Tf*B)
        fy, _ = _frames_t(y_sig, W, hop)
        sums = _stft_l1_sums(fx, fy, cb, Kpad)         # (C,) per-channel abs-diff sums
        n_elems = jnp.float32(B * Tf * K)              # unpadded element count
        bw_loss = jnp.sum((sums / n_elems) * ch_w) / C
        total = total + bw_loss
    return total / len(config.block_widths)


# ---------------------------------------------------------------------------
# pure-JAX reference (no Pallas) for a sanity check
# ---------------------------------------------------------------------------
def _frames_ref(sig: jnp.ndarray, W: int, hop: int) -> jnp.ndarray:
    B, L = sig.shape
    pad = W // 2
    padded = jnp.pad(sig, ((0, 0), (pad, pad)))
    T = 1 + L // hop
    idx = jnp.arange(T)[:, None] * hop + jnp.arange(W)[None, :]
    return padded[:, idx]                              # (B, T, W)


def _reference_loss(x, y, config):
    B, C, F, T = x.shape
    L = F * T
    total = 0.0
    for W in config.block_widths:
        hop = W // config.block_overlap
        cb, K, Kpad = _fused_basis(W)
        cre = jnp.transpose(cb[:K])                    # (W, K)
        cim = jnp.transpose(cb[Kpad:Kpad + K])         # (W, K)
        bw_loss = 0.0
        for c in range(C):
            fx = _frames_ref(x[:, c].reshape(B, L).astype(jnp.float32), W, hop)
            fy = _frames_ref(y[:, c].reshape(B, L).astype(jnp.float32), W, hop)
            xm = jnp.sqrt(jnp.einsum("btw,wk->btk", fx, cre) ** 2 +
                          jnp.einsum("btw,wk->btk", fx, cim) ** 2)
            ym = jnp.sqrt(jnp.einsum("btw,wk->btk", fy, cre) ** 2 +
                          jnp.einsum("btw,wk->btk", fy, cim) ** 2)
            cl = jnp.mean(jnp.abs(jnp.log1p(xm) - jnp.log1p(ym)))
            if c == 1:
                cl = cl * config.stereo_weight
            bw_loss = bw_loss + cl
        total = total + bw_loss / C
    return total / len(config.block_widths)


if __name__ == "__main__":
    cfg = MultiscaleSpectralLossConfig()
    key = jax.random.PRNGKey(0)
    kx, ky = jax.random.split(key)
    # small shapes consistent with the module: (batch=2, channels=2, freq=16, time=16)
    x = jax.random.normal(kx, (2, 2, 16, 16), dtype=jnp.float32)
    y = jax.random.normal(ky, (2, 2, 16, 16), dtype=jnp.float32)

    loss_fn = jax.jit(functools.partial(multiscale_spectral_loss, config=cfg))
    loss = jax.block_until_ready(loss_fn(x, y))

    ref = jax.block_until_ready(_reference_loss(x, y, cfg))
    assert np.isfinite(float(loss))
    assert abs(float(loss) - float(ref)) < 1e-2 * max(1.0, abs(float(ref))), \
        (float(loss), float(ref))
    print("KERNEL_OK")
</pallas_src>

<mosaic_0001>
module attributes {stable_mosaic.version = 11 : i64} {
  func.func @_stft_l1_kernel(%arg0: i32, %arg1: i32, %arg2: memref<1x32x256xf32, #tpu.memory_space<vmem>>, %arg3: memref<1x32x256xf32, #tpu.memory_space<vmem>>, %arg4: memref<48x32xf32, #tpu.memory_space<vmem>>, %arg5: memref<1x8x128xf32, #tpu.memory_space<vmem>>, %arg6: memref<24x256xf32, #tpu.memory_space<vmem>>) attributes {dimension_semantics = [#tpu.dimension_semantics<parallel>, #tpu.dimension_semantics<arbitrary>], iteration_bounds = array<i64: 2, 1>, scalar_prefetch = 0 : i64, scratch_operands = 1 : i64, tpu.core_type = #tpu.core_type<tc>, window_params = [{transform_indices = @transform_0, window_bounds = array<i64: 1, 32, 256>}, {transform_indices = @transform_1, window_bounds = array<i64: 1, 32, 256>}, {pipeline_mode = #tpu.pipeline_mode<synchronous>, transform_indices = @transform_2, window_bounds = array<i64: 48, 32>}, {transform_indices = @transform_3, window_bounds = array<i64: 1, 8, 128>}]} {
    %c0_i32 = arith.constant 0 : i32
    %0 = arith.cmpi eq, %arg1, %c0_i32 : i32
    %1 = arith.extui %0 : i1 to i32
    %c0_i32_0 = arith.constant 0 : i32
    %2 = arith.cmpi ne, %1, %c0_i32_0 : i32
    scf.if %2 {
      %cst_15 = arith.constant 0.000000e+00 : f32
      %36 = vector.broadcast %cst_15 : f32 to vector<24x256xf32>
      %c0_16 = arith.constant 0 : index
      %c0_17 = arith.constant 0 : index
      %37 = vector.load %arg6[%c0_16, %c0_17] : memref<24x256xf32, #tpu.memory_space<vmem>>, vector<24x256xf32>
      tpu.vector_store %arg6[%c0_16, %c0_17], %36 {strides = array<i32>} : memref<24x256xf32, #tpu.memory_space<vmem>>, vector<24x256xf32>,
    } else {
    }
    %c0 = arith.constant 0 : index
    %c0_1 = arith.constant 0 : index
    %c0_2 = arith.constant 0 : index
    %3 = vector.load %arg2[%c0, %c0_1, %c0_2] : memref<1x32x256xf32, #tpu.memory_space<vmem>>, vector<1x32x256xf32>
    %4 = vector.shape_cast %3 : vector<1x32x256xf32> to vector<32x256xf32>
    %c0_3 = arith.constant 0 : index
    %c0_4 = arith.constant 0 : index
    %c0_5 = arith.constant 0 : index
    %5 = vector.load %arg3[%c0_3, %c0_4, %c0_5] : memref<1x32x256xf32, #tpu.memory_space<vmem>>, vector<1x32x256xf32>
    %6 = vector.shape_cast %5 : vector<1x32x256xf32> to vector<32x256xf32>
    %c0_6 = arith.constant 0 : index
    %c0_7 = arith.constant 0 : index
    %7 = vector.load %arg4[%c0_6, %c0_7] : memref<48x32xf32, #tpu.memory_space<vmem>>, vector<48x32xf32>
    %cst = arith.constant dense<0.000000e+00> : vector<48x256xf32>
    %8 = tpu.matmul %7, %4, %cst {dimension_numbers = #tpu.dot_dimension_numbers<[1], [0], [0], [1], [0, 0, 1, 1], [], []>} : vector<48x32xf32>, vector<32x256xf32>, vector<48x256xf32> -> vector<48x256xf32>
    %cst_8 = arith.constant dense<0.000000e+00> : vector<48x256xf32>
    %9 = tpu.matmul %7, %6, %cst_8 {dimension_numbers = #tpu.dot_dimension_numbers<[1], [0], [0], [1], [0, 0, 1, 1], [], []>} : vector<48x32xf32>, vector<32x256xf32>, vector<48x256xf32> -> vector<48x256xf32>
    %10 = vector.extract_strided_slice %8 {offsets = [0, 0], sizes = [24, 256], strides = [1, 1]} : vector<48x256xf32> to vector<24x256xf32>
    %11 = vector.extract_strided_slice %8 {offsets = [0, 0], sizes = [24, 256], strides = [1, 1]} : vector<48x256xf32> to vector<24x256xf32>
    %12 = arith.mulf %10, %11 : vector<24x256xf32>
    %13 = vector.extract_strided_slice %8 {offsets = [24, 0], sizes = [24, 256], strides = [1, 1]} : vector<48x256xf32> to vector<24x256xf32>
    %14 = vector.extract_strided_slice %8 {offsets = [24, 0], sizes = [24, 256], strides = [1, 1]} : vector<48x256xf32> to vector<24x256xf32>
    %15 = arith.mulf %13, %14 : vector<24x256xf32>
    %16 = arith.addf %12, %15 : vector<24x256xf32>
    %17 = math.sqrt %16 : vector<24x256xf32>
    %18 = vector.extract_strided_slice %9 {offsets = [0, 0], sizes = [24, 256], strides = [1, 1]} : vector<48x256xf32> to vector<24x256xf32>
    %19 = vector.extract_strided_slice %9 {offsets = [0, 0], sizes = [24, 256], strides = [1, 1]} : vector<48x256xf32> to vector<24x256xf32>
    %20 = arith.mulf %18, %19 : vector<24x256xf32>
    %21 = vector.extract_strided_slice %9 {offsets = [24, 0], sizes = [24, 256], strides = [1, 1]} : vector<48x256xf32> to vector<24x256xf32>
    %22 = vector.extract_strided_slice %9 {offsets = [24, 0], sizes = [24, 256], strides = [1, 1]} : vector<48x256xf32> to vector<24x256xf32>
    %23 = arith.mulf %21, %22 : vector<24x256xf32>
    %24 = arith.addf %20, %23 : vector<24x256xf32>
    %25 = math.sqrt %24 : vector<24x256xf32>
    %c0_9 = arith.constant 0 : index
    %c0_10 = arith.constant 0 : index
    %26 = vector.load %arg6[%c0_9, %c0_10] : memref<24x256xf32, #tpu.memory_space<vmem>>, vector<24x256xf32>
    %27 = math.log1p %17 : vector<24x256xf32>
    %28 = math.log1p %25 : vector<24x256xf32>
    %29 = arith.subf %27, %28 : vector<24x256xf32>
    %30 = math.absf %29 : vector<24x256xf32>
    %31 = arith.addf %26, %30 : vector<24x256xf32>
    %c0_11 = arith.constant 0 : index
    %c0_12 = arith.constant 0 : index
    %32 = vector.load %arg6[%c0_11, %c0_12] : memref<24x256xf32, #tpu.memory_space<vmem>>, vector<24x256xf32>
    tpu.vector_store %arg6[%c0_11, %c0_12], %31 {strides = array<i32>} : memref<24x256xf32, #tpu.memory_space<vmem>>, vector<24x256xf32>,
    %c0_i32_13 = arith.constant 0 : i32
    %33 = arith.cmpi eq, %arg1, %c0_i32_13 : i32
    %34 = arith.extui %33 : i1 to i32
    %c0_i32_14 = arith.constant 0 : i32
    %35 = arith.cmpi ne, %34, %c0_i32_14 : i32
    scf.if %35 {
      %c0_15 = arith.constant 0 : index
      %c0_16 = arith.constant 0 : index
      %36 = vector.load %arg6[%c0_15, %c0_16] : memref<24x256xf32, #tpu.memory_space<vmem>>, vector<24x256xf32>
      %37 = vector.shape_cast %36 : vector<24x256xf32> to vector<1x24x256xf32>
      %cst_17 = arith.constant dense<0.000000e+00> : vector<1xf32>
      %38 = vector.multi_reduction <add>, %37, %cst_17 [1, 2] : vector<1x24x256xf32> to vector<1xf32>
      %39 = vector.shape_cast %38 : vector<1xf32> to vector<1x1x1xf32>
      %40 = vector.extract %39[0, 0, 0] : f32 from vector<1x1x1xf32>
      %41 = vector.broadcast %40 : f32 to vector<1x8x128xf32>
      %c0_18 = arith.constant 0 : index
      %c0_19 = arith.constant 0 : index
      %c0_20 = arith.constant 0 : index
      %42 = vector.load %arg5[%c0_18, %c0_19, %c0_20] : memref<1x8x128xf32, #tpu.memory_space<vmem>>, vector<1x8x128xf32>
      tpu.vector_store %arg5[%c0_18, %c0_19, %c0_20], %41 {strides = array<i32>} : memref<1x8x128xf32, #tpu.memory_space<vmem>>, vector<1x8x128xf32>,
    } else {
    }
    return
  }
  func.func @transform_0(%arg0: i32, %arg1: i32) -> (i32, i32, i32) {
    %c0_i32 = arith.constant 0 : i32
    %c0_i32_0 = arith.constant 0 : i32
    return %arg0, %c0_i32, %arg1 : i32, i32, i32
  }
  func.func @transform_1(%arg0: i32, %arg1: i32) -> (i32, i32, i32) {
    %c0_i32 = arith.constant 0 : i32
    %c0_i32_0 = arith.constant 0 : i32
    return %arg0, %c0_i32, %arg1 : i32, i32, i32
  }
  func.func @transform_2(%arg0: i32, %arg1: i32) -> (i32, i32) {
    %c0_i32 = arith.constant 0 : i32
    %c0_i32_0 = arith.constant 0 : i32
    %c0_i32_1 = arith.constant 0 : i32
    return %c0_i32, %c0_i32_0 : i32, i32
  }
  func.func @transform_3(%arg0: i32, %arg1: i32) -> (i32, i32, i32) {
    %c0_i32 = arith.constant 0 : i32
    %c0_i32_0 = arith.constant 0 : i32
    %c0_i32_1 = arith.constant 0 : i32
    return %arg0, %c0_i32, %c0_i32_0 : i32, i32, i32
  }
}

module attributes {stable_mosaic.version = 11 : i64} {
  func.func @_stft_l1_kernel(%arg0: i32, %arg1: i32, %arg2: memref<1x64x128xf32, #tpu.memory_space<vmem>>, %arg3: memref<1x64x128xf32, #tpu.memory_space<vmem>>, %arg4: memref<80x64xf32, #tpu.memory_space<vmem>>, %arg5: memref<1x8x128xf32, #tpu.memory_space<vmem>>, %arg6: memref<40x128xf32, #tpu.memory_space<vmem>>) attributes {dimension_semantics = [#tpu.dimension_semantics<parallel>, #tpu.dimension_semantics<arbitrary>], iteration_bounds = array<i64: 2, 1>, scalar_prefetch = 0 : i64, scratch_operands = 1 : i64, tpu.core_type = #tpu.core_type<tc>, window_params = [{transform_indices = @transform_0, window_bounds = array<i64: 1, 64, 128>}, {transform_indices = @transform_1, window_bounds = array<i64: 1, 64, 128>}, {pipeline_mode = #tpu.pipeline_mode<synchronous>, transform_indices = @transform_2, window_bounds = array<i64: 80, 64>}, {transform_indices = @transform_3, window_bounds = array<i64: 1, 8, 128>}]} {
    %c0_i32 = arith.constant 0 : i32
    %0 = arith.cmpi eq, %arg1, %c0_i32 : i32
    %1 = arith.extui %0 : i1 to i32
    %c0_i32_0 = arith.constant 0 : i32
    %2 = arith.cmpi ne, %1, %c0_i32_0 : i32
    scf.if %2 {
      %cst_15 = arith.constant 0.000000e+00 : f32
      %36 = vector.broadcast %cst_15 : f32 to vector<40x128xf32>
      %c0_16 = arith.constant 0 : index
      %c0_17 = arith.constant 0 : index
      %37 = vector.load %arg6[%c0_16, %c0_17] : memref<40x128xf32, #tpu.memory_space<vmem>>, vector<40x128xf32>
      tpu.vector_store %arg6[%c0_16, %c0_17], %36 {strides = array<i32>} : memref<40x128xf32, #tpu.memory_space<vmem>>, vector<40x128xf32>,
    } else {
    }
    %c0 = arith.constant 0 : index
    %c0_1 = arith.constant 0 : index
    %c0_2 = arith.constant 0 : index
    %3 = vector.load %arg2[%c0, %c0_1, %c0_2] : memref<1x64x128xf32, #tpu.memory_space<vmem>>, vector<1x64x128xf32>
    %4 = vector.shape_cast %3 : vector<1x64x128xf32> to vector<64x128xf32>
    %c0_3 = arith.constant 0 : index
    %c0_4 = arith.constant 0 : index
    %c0_5 = arith.constant 0 : index
    %5 = vector.load %arg3[%c0_3, %c0_4, %c0_5] : memref<1x64x128xf32, #tpu.memory_space<vmem>>, vector<1x64x128xf32>
    %6 = vector.shape_cast %5 : vector<1x64x128xf32> to vector<64x128xf32>
    %c0_6 = arith.constant 0 : index
    %c0_7 = arith.constant 0 : index
    %7 = vector.load %arg4[%c0_6, %c0_7] : memref<80x64xf32, #tpu.memory_space<vmem>>, vector<80x64xf32>
    %cst = arith.constant dense<0.000000e+00> : vector<80x128xf32>
    %8 = tpu.matmul %7, %4, %cst {dimension_numbers = #tpu.dot_dimension_numbers<[1], [0], [0], [1], [0, 0, 1, 1], [], []>} : vector<80x64xf32>, vector<64x128xf32>, vector<80x128xf32> -> vector<80x128xf32>
    %cst_8 = arith.constant dense<0.000000e+00> : vector<80x128xf32>
    %9 = tpu.matmul %7, %6, %cst_8 {dimension_numbers = #tpu.dot_dimension_numbers<[1], [0], [0], [1], [0, 0, 1, 1], [], []>} : vector<80x64xf32>, vector<64x128xf32>, vector<80x128xf32> -> vector<80x128xf32>
    %10 = vector.extract_strided_slice %8 {offsets = [0, 0], sizes = [40, 128], strides = [1, 1]} : vector<80x128xf32> to vector<40x128xf32>
    %11 = vector.extract_strided_slice %8 {offsets = [0, 0], sizes = [40, 128], strides = [1, 1]} : vector<80x128xf32> to vector<40x128xf32>
    %12 = arith.mulf %10, %11 : vector<40x128xf32>
    %13 = vector.extract_strided_slice %8 {offsets = [40, 0], sizes = [40, 128], strides = [1, 1]} : vector<80x128xf32> to vector<40x128xf32>
    %14 = vector.extract_strided_slice %8 {offsets = [40, 0], sizes = [40, 128], strides = [1, 1]} : vector<80x128xf32> to vector<40x128xf32>
    %15 = arith.mulf %13, %14 : vector<40x128xf32>
    %16 = arith.addf %12, %15 : vector<40x128xf32>
    %17 = math.sqrt %16 : vector<40x128xf32>
    %18 = vector.extract_strided_slice %9 {offsets = [0, 0], sizes = [40, 128], strides = [1, 1]} : vector<80x128xf32> to vector<40x128xf32>
    %19 = vector.extract_strided_slice %9 {offsets = [0, 0], sizes = [40, 128], strides = [1, 1]} : vector<80x128xf32> to vector<40x128xf32>
    %20 = arith.mulf %18, %19 : vector<40x128xf32>
    %21 = vector.extract_strided_slice %9 {offsets = [40, 0], sizes = [40, 128], strides = [1, 1]} : vector<80x128xf32> to vector<40x128xf32>
    %22 = vector.extract_strided_slice %9 {offsets = [40, 0], sizes = [40, 128], strides = [1, 1]} : vector<80x128xf32> to vector<40x128xf32>
    %23 = arith.mulf %21, %22 : vector<40x128xf32>
    %24 = arith.addf %20, %23 : vector<40x128xf32>
    %25 = math.sqrt %24 : vector<40x128xf32>
    %c0_9 = arith.constant 0 : index
    %c0_10 = arith.constant 0 : index
    %26 = vector.load %arg6[%c0_9, %c0_10] : memref<40x128xf32, #tpu.memory_space<vmem>>, vector<40x128xf32>
    %27 = math.log1p %17 : vector<40x128xf32>
    %28 = math.log1p %25 : vector<40x128xf32>
    %29 = arith.subf %27, %28 : vector<40x128xf32>
    %30 = math.absf %29 : vector<40x128xf32>
    %31 = arith.addf %26, %30 : vector<40x128xf32>
    %c0_11 = arith.constant 0 : index
    %c0_12 = arith.constant 0 : index
    %32 = vector.load %arg6[%c0_11, %c0_12] : memref<40x128xf32, #tpu.memory_space<vmem>>, vector<40x128xf32>
    tpu.vector_store %arg6[%c0_11, %c0_12], %31 {strides = array<i32>} : memref<40x128xf32, #tpu.memory_space<vmem>>, vector<40x128xf32>,
    %c0_i32_13 = arith.constant 0 : i32
    %33 = arith.cmpi eq, %arg1, %c0_i32_13 : i32
    %34 = arith.extui %33 : i1 to i32
    %c0_i32_14 = arith.constant 0 : i32
    %35 = arith.cmpi ne, %34, %c0_i32_14 : i32
    scf.if %35 {
      %c0_15 = arith.constant 0 : index
      %c0_16 = arith.constant 0 : index
      %36 = vector.load %arg6[%c0_15, %c0_16] : memref<40x128xf32, #tpu.memory_space<vmem>>, vector<40x128xf32>
      %37 = vector.shape_cast %36 : vector<40x128xf32> to vector<1x40x128xf32>
      %cst_17 = arith.constant dense<0.000000e+00> : vector<1xf32>
      %38 = vector.multi_reduction <add>, %37, %cst_17 [1, 2] : vector<1x40x128xf32> to vector<1xf32>
      %39 = vector.shape_cast %38 : vector<1xf32> to vector<1x1x1xf32>
      %40 = vector.extract %39[0, 0, 0] : f32 from vector<1x1x1xf32>
      %41 = vector.broadcast %40 : f32 to vector<1x8x128xf32>
      %c0_18 = arith.constant 0 : index
      %c0_19 = arith.constant 0 : index
      %c0_20 = arith.constant 0 : index
      %42 = vector.load %arg5[%c0_18, %c0_19, %c0_20] : memref<1x8x128xf32, #tpu.memory_space<vmem>>, vector<1x8x128xf32>
      tpu.vector_store %arg5[%c0_18, %c0_19, %c0_20], %41 {strides = array<i32>} : memref<1x8x128xf32, #tpu.memory_space<vmem>>, vector<1x8x128xf32>,
    } else {
    }
    return
  }
  func.func @transform_0(%arg0: i32, %arg1: i32) -> (i32, i32, i32) {
    %c0_i32 = arith.constant 0 : i32
    %c0_i32_0 = arith.constant 0 : i32
    return %arg0, %c0_i32, %arg1 : i32, i32, i32
  }
  func.func @transform_1(%arg0: i32, %arg1: i32) -> (i32, i32, i32) {
    %c0_i32 = arith.constant 0 : i32
    %c0_i32_0 = arith.constant 0 : i32
    return %arg0, %c0_i32, %arg1 : i32, i32, i32
  }
  func.func @transform_2(%arg0: i32, %arg1: i32) -> (i32, i32) {
    %c0_i32 = arith.constant 0 : i32
    %c0_i32_0 = arith.constant 0 : i32
    %c0_i32_1 = arith.constant 0 : i32
    return %c0_i32, %c0_i32_0 : i32, i32
  }
  func.func @transform_3(%arg0: i32, %arg1: i32) -> (i32, i32, i32) {
    %c0_i32 = arith.constant 0 : i32
    %c0_i32_0 = arith.constant 0 : i32
    %c0_i32_1 = arith.constant 0 : i32
    return %arg0, %c0_i32, %c0_i32_0 : i32, i32, i32
  }
}

module attributes {stable_mosaic.version = 11 : i64} {
  func.func @_stft_l1_kernel(%arg0: i32, %arg1: i32, %arg2: memref<1x16x384xf32, #tpu.memory_space<vmem>>, %arg3: memref<1x16x384xf32, #tpu.memory_space<vmem>>, %arg4: memref<32x16xf32, #tpu.memory_space<vmem>>, %arg5: memref<1x8x128xf32, #tpu.memory_space<vmem>>, %arg6: memref<16x384xf32, #tpu.memory_space<vmem>>) attributes {dimension_semantics = [#tpu.dimension_semantics<parallel>, #tpu.dimension_semantics<arbitrary>], iteration_bounds = array<i64: 2, 1>, scalar_prefetch = 0 : i64, scratch_operands = 1 : i64, tpu.core_type = #tpu.core_type<tc>, window_params = [{transform_indices = @transform_0, window_bounds = array<i64: 1, 16, 384>}, {transform_indices = @transform_1, window_bounds = array<i64: 1, 16, 384>}, {pipeline_mode = #tpu.pipeline_mode<synchronous>, transform_indices = @transform_2, window_bounds = array<i64: 32, 16>}, {transform_indices = @transform_3, window_bounds = array<i64: 1, 8, 128>}]} {
    %c0_i32 = arith.constant 0 : i32
    %0 = arith.cmpi eq, %arg1, %c0_i32 : i32
    %1 = arith.extui %0 : i1 to i32
    %c0_i32_0 = arith.constant 0 : i32
    %2 = arith.cmpi ne, %1, %c0_i32_0 : i32
    scf.if %2 {
      %cst_15 = arith.constant 0.000000e+00 : f32
      %36 = vector.broadcast %cst_15 : f32 to vector<16x384xf32>
      %c0_16 = arith.constant 0 : index
      %c0_17 = arith.constant 0 : index
      %37 = vector.load %arg6[%c0_16, %c0_17] : memref<16x384xf32, #tpu.memory_space<vmem>>, vector<16x384xf32>
      tpu.vector_store %arg6[%c0_16, %c0_17], %36 {strides = array<i32>} : memref<16x384xf32, #tpu.memory_space<vmem>>, vector<16x384xf32>,
    } else {
    }
    %c0 = arith.constant 0 : index
    %c0_1 = arith.constant 0 : index
    %c0_2 = arith.constant 0 : index
    %3 = vector.load %arg2[%c0, %c0_1, %c0_2] : memref<1x16x384xf32, #tpu.memory_space<vmem>>, vector<1x16x384xf32>
    %4 = vector.shape_cast %3 : vector<1x16x384xf32> to vector<16x384xf32>
    %c0_3 = arith.constant 0 : index
    %c0_4 = arith.constant 0 : index
    %c0_5 = arith.constant 0 : index
    %5 = vector.load %arg3[%c0_3, %c0_4, %c0_5] : memref<1x16x384xf32, #tpu.memory_space<vmem>>, vector<1x16x384xf32>
    %6 = vector.shape_cast %5 : vector<1x16x384xf32> to vector<16x384xf32>
    %c0_6 = arith.constant 0 : index
    %c0_7 = arith.constant 0 : index
    %7 = vector.load %arg4[%c0_6, %c0_7] : memref<32x16xf32, #tpu.memory_space<vmem>>, vector<32x16xf32>
    %cst = arith.constant dense<0.000000e+00> : vector<32x384xf32>
    %8 = tpu.matmul %7, %4, %cst {dimension_numbers = #tpu.dot_dimension_numbers<[1], [0], [0], [1], [0, 0, 1, 1], [], []>} : vector<32x16xf32>, vector<16x384xf32>, vector<32x384xf32> -> vector<32x384xf32>
    %cst_8 = arith.constant dense<0.000000e+00> : vector<32x384xf32>
    %9 = tpu.matmul %7, %6, %cst_8 {dimension_numbers = #tpu.dot_dimension_numbers<[1], [0], [0], [1], [0, 0, 1, 1], [], []>} : vector<32x16xf32>, vector<16x384xf32>, vector<32x384xf32> -> vector<32x384xf32>
    %10 = vector.extract_strided_slice %8 {offsets = [0, 0], sizes = [16, 384], strides = [1, 1]} : vector<32x384xf32> to vector<16x384xf32>
    %11 = vector.extract_strided_slice %8 {offsets = [0, 0], sizes = [16, 384], strides = [1, 1]} : vector<32x384xf32> to vector<16x384xf32>
    %12 = arith.mulf %10, %11 : vector<16x384xf32>
    %13 = vector.extract_strided_slice %8 {offsets = [16, 0], sizes = [16, 384], strides = [1, 1]} : vector<32x384xf32> to vector<16x384xf32>
    %14 = vector.extract_strided_slice %8 {offsets = [16, 0], sizes = [16, 384], strides = [1, 1]} : vector<32x384xf32> to vector<16x384xf32>
    %15 = arith.mulf %13, %14 : vector<16x384xf32>
    %16 = arith.addf %12, %15 : vector<16x384xf32>
    %17 = math.sqrt %16 : vector<16x384xf32>
    %18 = vector.extract_strided_slice %9 {offsets = [0, 0], sizes = [16, 384], strides = [1, 1]} : vector<32x384xf32> to vector<16x384xf32>
    %19 = vector.extract_strided_slice %9 {offsets = [0, 0], sizes = [16, 384], strides = [1, 1]} : vector<32x384xf32> to vector<16x384xf32>
    %20 = arith.mulf %18, %19 : vector<16x384xf32>
    %21 = vector.extract_strided_slice %9 {offsets = [16, 0], sizes = [16, 384], strides = [1, 1]} : vector<32x384xf32> to vector<16x384xf32>
    %22 = vector.extract_strided_slice %9 {offsets = [16, 0], sizes = [16, 384], strides = [1, 1]} : vector<32x384xf32> to vector<16x384xf32>
    %23 = arith.mulf %21, %22 : vector<16x384xf32>
    %24 = arith.addf %20, %23 : vector<16x384xf32>
    %25 = math.sqrt %24 : vector<16x384xf32>
    %c0_9 = arith.constant 0 : index
    %c0_10 = arith.constant 0 : index
    %26 = vector.load %arg6[%c0_9, %c0_10] : memref<16x384xf32, #tpu.memory_space<vmem>>, vector<16x384xf32>
    %27 = math.log1p %17 : vector<16x384xf32>
    %28 = math.log1p %25 : vector<16x384xf32>
    %29 = arith.subf %27, %28 : vector<16x384xf32>
    %30 = math.absf %29 : vector<16x384xf32>
    %31 = arith.addf %26, %30 : vector<16x384xf32>
    %c0_11 = arith.constant 0 : index
    %c0_12 = arith.constant 0 : index
    %32 = vector.load %arg6[%c0_11, %c0_12] : memref<16x384xf32, #tpu.memory_space<vmem>>, vector<16x384xf32>
    tpu.vector_store %arg6[%c0_11, %c0_12], %31 {strides = array<i32>} : memref<16x384xf32, #tpu.memory_space<vmem>>, vector<16x384xf32>,
    %c0_i32_13 = arith.constant 0 : i32
    %33 = arith.cmpi eq, %arg1, %c0_i32_13 : i32
    %34 = arith.extui %33 : i1 to i32
    %c0_i32_14 = arith.constant 0 : i32
    %35 = arith.cmpi ne, %34, %c0_i32_14 : i32
    scf.if %35 {
      %c0_15 = arith.constant 0 : index
      %c0_16 = arith.constant 0 : index
      %36 = vector.load %arg6[%c0_15, %c0_16] : memref<16x384xf32, #tpu.memory_space<vmem>>, vector<16x384xf32>
      %37 = vector.shape_cast %36 : vector<16x384xf32> to vector<1x16x384xf32>
      %cst_17 = arith.constant dense<0.000000e+00> : vector<1xf32>
      %38 = vector.multi_reduction <add>, %37, %cst_17 [1, 2] : vector<1x16x384xf32> to vector<1xf32>
      %39 = vector.shape_cast %38 : vector<1xf32> to vector<1x1x1xf32>
      %40 = vector.extract %39[0, 0, 0] : f32 from vector<1x1x1xf32>
      %41 = vector.broadcast %40 : f32 to vector<1x8x128xf32>
      %c0_18 = arith.constant 0 : index
      %c0_19 = arith.constant 0 : index
      %c0_20 = arith.constant 0 : index
      %42 = vector.load %arg5[%c0_18, %c0_19, %c0_20] : memref<1x8x128xf32, #tpu.memory_space<vmem>>, vector<1x8x128xf32>
      tpu.vector_store %arg5[%c0_18, %c0_19, %c0_20], %41 {strides = array<i32>} : memref<1x8x128xf32, #tpu.memory_space<vmem>>, vector<1x8x128xf32>,
    } else {
    }
    return
  }
  func.func @transform_0(%arg0: i32, %arg1: i32) -> (i32, i32, i32) {
    %c0_i32 = arith.constant 0 : i32
    %c0_i32_0 = arith.constant 0 : i32
    return %arg0, %c0_i32, %arg1 : i32, i32, i32
  }
  func.func @transform_1(%arg0: i32, %arg1: i32) -> (i32, i32, i32) {
    %c0_i32 = arith.constant 0 : i32
    %c0_i32_0 = arith.constant 0 : i32
    return %arg0, %c0_i32, %arg1 : i32, i32, i32
  }
  func.func @transform_2(%arg0: i32, %arg1: i32) -> (i32, i32) {
    %c0_i32 = arith.constant 0 : i32
    %c0_i32_0 = arith.constant 0 : i32
    %c0_i32_1 = arith.constant 0 : i32
    return %c0_i32, %c0_i32_0 : i32, i32
  }
  func.func @transform_3(%arg0: i32, %arg1: i32) -> (i32, i32, i32) {
    %c0_i32 = arith.constant 0 : i32
    %c0_i32_0 = arith.constant 0 : i32
    %c0_i32_1 = arith.constant 0 : i32
    return %arg0, %c0_i32, %c0_i32_0 : i32, i32, i32
  }
}

module attributes {stable_mosaic.version = 11 : i64} {
  func.func @_stft_l1_kernel(%arg0: i32, %arg1: i32, %arg2: memref<1x8x640xf32, #tpu.memory_space<vmem>>, %arg3: memref<1x8x640xf32, #tpu.memory_space<vmem>>, %arg4: memref<16x8xf32, #tpu.memory_space<vmem>>, %arg5: memref<1x8x128xf32, #tpu.memory_space<vmem>>, %arg6: memref<8x640xf32, #tpu.memory_space<vmem>>) attributes {dimension_semantics = [#tpu.dimension_semantics<parallel>, #tpu.dimension_semantics<arbitrary>], iteration_bounds = array<i64: 2, 1>, scalar_prefetch = 0 : i64, scratch_operands = 1 : i64, tpu.core_type = #tpu.core_type<tc>, window_params = [{transform_indices = @transform_0, window_bounds = array<i64: 1, 8, 640>}, {transform_indices = @transform_1, window_bounds = array<i64: 1, 8, 640>}, {pipeline_mode = #tpu.pipeline_mode<synchronous>, transform_indices = @transform_2, window_bounds = array<i64: 16, 8>}, {transform_indices = @transform_3, window_bounds = array<i64: 1, 8, 128>}]} {
    %c0_i32 = arith.constant 0 : i32
    %0 = arith.cmpi eq, %arg1, %c0_i32 : i32
    %1 = arith.extui %0 : i1 to i32
    %c0_i32_0 = arith.constant 0 : i32
    %2 = arith.cmpi ne, %1, %c0_i32_0 : i32
    scf.if %2 {
      %cst_15 = arith.constant 0.000000e+00 : f32
      %36 = vector.broadcast %cst_15 : f32 to vector<8x640xf32>
      %c0_16 = arith.constant 0 : index
      %c0_17 = arith.constant 0 : index
      %37 = vector.load %arg6[%c0_16, %c0_17] : memref<8x640xf32, #tpu.memory_space<vmem>>, vector<8x640xf32>
      tpu.vector_store %arg6[%c0_16, %c0_17], %36 {strides = array<i32>} : memref<8x640xf32, #tpu.memory_space<vmem>>, vector<8x640xf32>,
    } else {
    }
    %c0 = arith.constant 0 : index
    %c0_1 = arith.constant 0 : index
    %c0_2 = arith.constant 0 : index
    %3 = vector.load %arg2[%c0, %c0_1, %c0_2] : memref<1x8x640xf32, #tpu.memory_space<vmem>>, vector<1x8x640xf32>
    %4 = vector.shape_cast %3 : vector<1x8x640xf32> to vector<8x640xf32>
    %c0_3 = arith.constant 0 : index
    %c0_4 = arith.constant 0 : index
    %c0_5 = arith.constant 0 : index
    %5 = vector.load %arg3[%c0_3, %c0_4, %c0_5] : memref<1x8x640xf32, #tpu.memory_space<vmem>>, vector<1x8x640xf32>
    %6 = vector.shape_cast %5 : vector<1x8x640xf32> to vector<8x640xf32>
    %c0_6 = arith.constant 0 : index
    %c0_7 = arith.constant 0 : index
    %7 = vector.load %arg4[%c0_6, %c0_7] : memref<16x8xf32, #tpu.memory_space<vmem>>, vector<16x8xf32>
    %cst = arith.constant dense<0.000000e+00> : vector<16x640xf32>
    %8 = tpu.matmul %7, %4, %cst {dimension_numbers = #tpu.dot_dimension_numbers<[1], [0], [0], [1], [0, 0, 1, 1], [], []>} : vector<16x8xf32>, vector<8x640xf32>, vector<16x640xf32> -> vector<16x640xf32>
    %cst_8 = arith.constant dense<0.000000e+00> : vector<16x640xf32>
    %9 = tpu.matmul %7, %6, %cst_8 {dimension_numbers = #tpu.dot_dimension_numbers<[1], [0], [0], [1], [0, 0, 1, 1], [], []>} : vector<16x8xf32>, vector<8x640xf32>, vector<16x640xf32> -> vector<16x640xf32>
    %10 = vector.extract_strided_slice %8 {offsets = [0, 0], sizes = [8, 640], strides = [1, 1]} : vector<16x640xf32> to vector<8x640xf32>
    %11 = vector.extract_strided_slice %8 {offsets = [0, 0], sizes = [8, 640], strides = [1, 1]} : vector<16x640xf32> to vector<8x640xf32>
    %12 = arith.mulf %10, %11 : vector<8x640xf32>
    %13 = vector.extract_strided_slice %8 {offsets = [8, 0], sizes = [8, 640], strides = [1, 1]} : vector<16x640xf32> to vector<8x640xf32>
    %14 = vector.extract_strided_slice %8 {offsets = [8, 0], sizes = [8, 640], strides = [1, 1]} : vector<16x640xf32> to vector<8x640xf32>
    %15 = arith.mulf %13, %14 : vector<8x640xf32>
    %16 = arith.addf %12, %15 : vector<8x640xf32>
    %17 = math.sqrt %16 : vector<8x640xf32>
    %18 = vector.extract_strided_slice %9 {offsets = [0, 0], sizes = [8, 640], strides = [1, 1]} : vector<16x640xf32> to vector<8x640xf32>
    %19 = vector.extract_strided_slice %9 {offsets = [0, 0], sizes = [8, 640], strides = [1, 1]} : vector<16x640xf32> to vector<8x640xf32>
    %20 = arith.mulf %18, %19 : vector<8x640xf32>
    %21 = vector.extract_strided_slice %9 {offsets = [8, 0], sizes = [8, 640], strides = [1, 1]} : vector<16x640xf32> to vector<8x640xf32>
    %22 = vector.extract_strided_slice %9 {offsets = [8, 0], sizes = [8, 640], strides = [1, 1]} : vector<16x640xf32> to vector<8x640xf32>
    %23 = arith.mulf %21, %22 : vector<8x640xf32>
    %24 = arith.addf %20, %23 : vector<8x640xf32>
    %25 = math.sqrt %24 : vector<8x640xf32>
    %c0_9 = arith.constant 0 : index
    %c0_10 = arith.constant 0 : index
    %26 = vector.load %arg6[%c0_9, %c0_10] : memref<8x640xf32, #tpu.memory_space<vmem>>, vector<8x640xf32>
    %27 = math.log1p %17 : vector<8x640xf32>
    %28 = math.log1p %25 : vector<8x640xf32>
    %29 = arith.subf %27, %28 : vector<8x640xf32>
    %30 = math.absf %29 : vector<8x640xf32>
    %31 = arith.addf %26, %30 : vector<8x640xf32>
    %c0_11 = arith.constant 0 : index
    %c0_12 = arith.constant 0 : index
    %32 = vector.load %arg6[%c0_11, %c0_12] : memref<8x640xf32, #tpu.memory_space<vmem>>, vector<8x640xf32>
    tpu.vector_store %arg6[%c0_11, %c0_12], %31 {strides = array<i32>} : memref<8x640xf32, #tpu.memory_space<vmem>>, vector<8x640xf32>,
    %c0_i32_13 = arith.constant 0 : i32
    %33 = arith.cmpi eq, %arg1, %c0_i32_13 : i32
    %34 = arith.extui %33 : i1 to i32
    %c0_i32_14 = arith.constant 0 : i32
    %35 = arith.cmpi ne, %34, %c0_i32_14 : i32
    scf.if %35 {
      %c0_15 = arith.constant 0 : index
      %c0_16 = arith.constant 0 : index
      %36 = vector.load %arg6[%c0_15, %c0_16] : memref<8x640xf32, #tpu.memory_space<vmem>>, vector<8x640xf32>
      %37 = vector.shape_cast %36 : vector<8x640xf32> to vector<1x8x640xf32>
      %cst_17 = arith.constant dense<0.000000e+00> : vector<1xf32>
      %38 = vector.multi_reduction <add>, %37, %cst_17 [1, 2] : vector<1x8x640xf32> to vector<1xf32>
      %39 = vector.shape_cast %38 : vector<1xf32> to vector<1x1x1xf32>
      %40 = vector.extract %39[0, 0, 0] : f32 from vector<1x1x1xf32>
      %41 = vector.broadcast %40 : f32 to vector<1x8x128xf32>
      %c0_18 = arith.constant 0 : index
      %c0_19 = arith.constant 0 : index
      %c0_20 = arith.constant 0 : index
      %42 = vector.load %arg5[%c0_18, %c0_19, %c0_20] : memref<1x8x128xf32, #tpu.memory_space<vmem>>, vector<1x8x128xf32>
      tpu.vector_store %arg5[%c0_18, %c0_19, %c0_20], %41 {strides = array<i32>} : memref<1x8x128xf32, #tpu.memory_space<vmem>>, vector<1x8x128xf32>,
    } else {
    }
    return
  }
  func.func @transform_0(%arg0: i32, %arg1: i32) -> (i32, i32, i32) {
    %c0_i32 = arith.constant 0 : i32
    %c0_i32_0 = arith.constant 0 : i32
    return %arg0, %c0_i32, %arg1 : i32, i32, i32
  }
  func.func @transform_1(%arg0: i32, %arg1: i32) -> (i32, i32, i32) {
    %c0_i32 = arith.constant 0 : i32
    %c0_i32_0 = arith.constant 0 : i32
    return %arg0, %c0_i32, %arg1 : i32, i32, i32
  }
  func.func @transform_2(%arg0: i32, %arg1: i32) -> (i32, i32) {
    %c0_i32 = arith.constant 0 : i32
    %c0_i32_0 = arith.constant 0 : i32
    %c0_i32_1 = arith.constant 0 : i32
    return %c0_i32, %c0_i32_0 : i32, i32
  }
  func.func @transform_3(%arg0: i32, %arg1: i32) -> (i32, i32, i32) {
    %c0_i32 = arith.constant 0 : i32
    %c0_i32_0 = arith.constant 0 : i32
    %c0_i32_1 = arith.constant 0 : i32
    return %arg0, %c0_i32, %c0_i32_0 : i32, i32, i32
  }
}

</mosaic_0001>

<bundles_post_ra>
// kernel: multiscale_spectral_loss.6
= control target key start
LH: loop header
LB: loop body
LE: loop exit
PB: predicated region body
PF: predicated region fallthrough
CT: control target
= control target key end

     0   :  { %s1016_s12 = smov 0   ;;  %s1018_s13 = smov 0   ;;  %s1369_s0 = inlined_call_operand.vmem [shape: f32[2,32,256], index: 0, kind: input, shape index: {}]   ;;  %s1370_s1 = inlined_call_operand.vmem [shape: f32[2,32,256], index: 1, kind: input, shape index: {}]   ;;  %s1371_s2 = inlined_call_operand.vmem [shape: f32[48,32], index: 2, kind: input, shape index: {}]   ;;  %s1372_s3 = inlined_call_operand.vmem [shape: f32[2,8,128], index: 3, kind: output, shape index: {}]  }
   0x1   :  { %s1020_s14 = smov 0  }
   0x2 LB: > { %s25_s15 = sadd.s32 1, %s989_s13  ;;  %p858_p0 = scmp.ge.s32.totalorder %s993_s14, 1  ;;  %s993_s14 = sphi %s1020_s14, %s13_s14   ;;  %s989_s13 = sphi %s1018_s13, %s1390_s13   ;;  %s985_s12 = sphi %s1016_s12, %s1389_s12  }
   0x3   : > { %p27_p1 = scmp.ge.s32.totalorder %s25_s15, 2  ;;  %p173_p2 = scmp.lt.s32.totalorder %s993_s14, 3 }
   0x5   : > { %s1392_s15 = smov (%p27_p1, %s25_s15), 0  ;;  %p174_p3 = pnand %p858_p0, %p173_p2 }
   0x6   : > { %p210_p4 = scmp.lt.s32.totalorder (!%p174_p3), %s985_s12, 1  ;;  %v995_v0 = vmov (!%p174_p3), 0.0   ;;  %v259_v25 = vld [vmem:[%s1371_s2] sm:$0xff] (!%p174_p3)  ;;  %vm265_vm0 = vcmask (!%p174_p3), 261120   ;;  %v260_v26 = vld [vmem:[%s1371_s2 + $0x8] sm:$0xff] (!%p174_p3)  ;;  %v261_v27 = vld [vmem:[%s1371_s2 + $0x10] sm:$0xff] (!%p174_p3) }
   0x7   : > { %177 = sbr.rel (%p174_p3) target bundleno = 525 (0x20d), region = 32  ;;  %348 = vmatprep.mubr.f32.mxu0 (!%p174_p3), %v995_v0  ;;  %449 = vmatprep.mubr.f32.mxu1 (!%p174_p3), %v995_v0  ;;  %v262_v28 = vld [vmem:[%s1371_s2 + $0x18] sm:$0xff] (!%p174_p3)  ;;  %v263_v29 = vld [vmem:[%s1371_s2 + $0x20] sm:$0xff] (!%p174_p3)  ;;  %v264_v30 = vld [vmem:[%s1371_s2 + $0x28] sm:$0xff] (!%p174_p3) }
   0xe   : > { %s1394_s12 = smov (!%p210_p4, %s985_s12), 1 }
   0xf   : > { %s878_s16 = sshll.u32 %s1394_s12, 6  ;;  %s863_s8 = sshll.u32 %s1394_s12, 3 }
  0x10   : > { %s217_s19 = scalar_lea.vmem %s1369_s0, %s878_s16  ;;  %s227_s22 = scalar_lea.vmem %s1370_s1, %s878_s16 }
  0x11   : > { %v244_v1 = vld [vmem:[%s217_s19 + $0x8] sm:$0xff]  ;;  %v246_v2 = vld [vmem:[%s217_s19 + $0x18] sm:$0xff]  ;;  %v243_v6 = vld [vmem:[%s217_s19] sm:$0xff]  ;;  %s232_s11 = scalar_lea.vmem %s1372_s3, %s863_s8 }
  0x12   : > { %v252_v3 = vld [vmem:[%s227_s22 + $0x8] sm:$0xff]  ;;  %v880_v4 = vpack.c.bf16 %v246_v2, %v244_v1  ;;  %v254_v5 = vld [vmem:[%s227_s22 + $0x18] sm:$0xff]  ;;  %v245_v7 = vld [vmem:[%s217_s19 + $0x10] sm:$0xff] }
  0x13   : > { %v888_v8 = vpack.c.bf16 %v254_v5, %v252_v3  ;;  %v882_v9 = vpack.c.bf16 %v245_v7, %v243_v6  ;;  %v251_v10 = vld [vmem:[%s227_s22] sm:$0xff]  ;;  %v253_v11 = vld [vmem:[%s227_s22 + $0x10] sm:$0xff]  ;;  %v248_v12 = vld [vmem:[%s217_s19 + $0x28] sm:$0xff] }
  0x14   : > { %881 = vmatprep.subr.bf16.mxu0 %v880_v4  ;;  %v890_v13 = vpack.c.bf16 %v253_v11, %v251_v10  ;;  %v250_v14 = vld [vmem:[%s217_s19 + $0x38] sm:$0xff]  ;;  %v256_v15 = vld [vmem:[%s227_s22 + $0x28] sm:$0xff]  ;;  %v247_v19 = vld [vmem:[%s217_s19 + $0x20] sm:$0xff] }
  0x15   : > { %v258_v16 = vld [vmem:[%s227_s22 + $0x38] sm:$0xff]  ;;  %889 = vmatprep.subr.bf16.mxu1 %v888_v8  ;;  %883 = vmatpush1.bf16.msra.mxu0 %v882_v9  ;;  %v884_v17 = vpack.c.bf16 %v250_v14, %v248_v12  ;;  %v249_v20 = vld [vmem:[%s217_s19 + $0x30] sm:$0xff]  ;;  %v255_v21 = vld [vmem:[%s227_s22 + $0x20] sm:$0xff] }
  0x16   : > { %v892_v18 = vpack.c.bf16 %v258_v16, %v256_v15  ;;  %891 = vmatpush1.bf16.msra.mxu1 %v890_v13  ;;  %v886_v22 = vpack.c.bf16 %v249_v20, %v247_v19  ;;  %v257_v23 = vld [vmem:[%s227_s22 + $0x30] sm:$0xff] }
  0x17   : > { %885 = vmatprep.subr.bf16.mxu0 %v884_v17  ;;  %v894_v24 = vpack.c.bf16 %v257_v23, %v255_v21 }
  0x18   : > { %893 = vmatprep.subr.bf16.mxu1 %v892_v18 }
  0x19   : > { %887 = vmatpush1.bf16.msra.mxu0 %v886_v22 }
  0x1a   : > { %895 = vmatpush1.bf16.msra.mxu1 %v894_v24 }
  0x1c   : > { %864 = vmatmul.mubr.msk.f32.vlgmr.msra.gmra.mrb[0].mxu0 %vm265_vm0, %v259_v25 }
  0x1d   : > { %870 = vmatmul.mubr.msk.f32.vlgmr.msra.gmra.mrb[0].mxu1 %vm265_vm0, %v259_v25  ;;  %354 = vmatprep.mubr.f32.mxu0 %v995_v0 }
  0x1e   : > { %455 = vmatprep.mubr.f32.mxu1 %v995_v0 }
  0x20   : > { %865 = vmatmul.mubr.msk.f32.gmra.mrb[2].mxu0 %vm265_vm0, %v260_v26 }
  0x21   : > { %871 = vmatmul.mubr.msk.f32.gmra.mrb[2].mxu1 %vm265_vm0, %v260_v26  ;;  %360 = vmatprep.mubr.f32.mxu0 %v995_v0 }
  0x22   : > { %461 = vmatprep.mubr.f32.mxu1 %v995_v0 }
  0x24   : > { %866 = vmatmul.mubr.msk.f32.gmra.mrb[4].mxu0 %vm265_vm0, %v261_v27 }
  0x25   : > { %872 = vmatmul.mubr.msk.f32.gmra.mrb[4].mxu1 %vm265_vm0, %v261_v27  ;;  %366 = vmatprep.mubr.f32.mxu0 %v995_v0 }
  0x26   : > { %467 = vmatprep.mubr.f32.mxu1 %v995_v0 }
  0x28   : > { %867 = vmatmul.mubr.msk.f32.gmra.mrb[6].mxu0 %vm265_vm0, %v262_v28 }
  0x29   : > { %873 = vmatmul.mubr.msk.f32.gmra.mrb[6].mxu1 %vm265_vm0, %v262_v28  ;;  %372 = vmatprep.mubr.f32.mxu0 %v995_v0 }
  0x2a   : > { %473 = vmatprep.mubr.f32.mxu1 %v995_v0 }
  0x2c   : > { %868 = vmatmul.mubr.msk.f32.gmra.mrb[8].mxu0 %vm265_vm0, %v263_v29 }
  0x2d   : > { %874 = vmatmul.mubr.msk.f32.gmra.mrb[8].mxu1 %vm265_vm0, %v263_v29  ;;  %378 = vmatprep.mubr.f32.mxu0 %v995_v0 }
  0x2e   : > { %479 = vmatprep.mubr.f32.mxu1 %v995_v0 }
  0x30   : > { %869 = vmatmul.mubr.msk.f32.gmra.mrb[10].mxu0 %vm265_vm0, %v264_v30 }
  0x31   : > { %875 = vmatmul.mubr.msk.f32.gmra.mrb[10].mxu1 %vm265_vm0, %v264_v30 }
  0xef   : > { %v350_v31 = vpop.f32.mrb[0].mxu0 }
  0xf0   : > { %v451_v32 = vpop.f32.mrb[0].mxu1  ;;  %v352_v33 = vpop.f32.mrb[1].mxu0  ;;  %v486_v44 = vmul.f32 %v350_v31, %v350_v31 }
  0xf1   : > { %v453_v34 = vpop.f32.mrb[1].mxu1  ;;  %v546_v48 = vmul.f32 %v451_v32, %v451_v32  ;;  %v487_v49 = vmul.f32 %v352_v33, %v352_v33 }
  0xf2   : > { %v547_v53 = vmul.f32 %v453_v34, %v453_v34 }
  0xf3   : > { %v356_v35 = vpop.f32.mrb[2].mxu0 }
  0xf4   : > { %v457_v36 = vpop.f32.mrb[2].mxu1  ;;  %v358_v37 = vpop.f32.mrb[3].mxu0  ;;  %v488_v62 = vmul.f32 %v356_v35, %v356_v35 }
  0xf5   : > { %v459_v38 = vpop.f32.mrb[3].mxu1  ;;  %v548_v63 = vmul.f32 %v457_v36, %v457_v36  ;;  %v489_v0 = vmul.f32 %v358_v37, %v358_v37 }
  0xf6   : > { %v549_v2 = vmul.f32 %v459_v38, %v459_v38 }
  0xf7   : > { %v362_v39 = vpop.f32.mrb[4].mxu0 }
  0xf8   : > { %v463_v40 = vpop.f32.mrb[4].mxu1  ;;  %v364_v41 = vpop.f32.mrb[5].mxu0  ;;  %v490_v3 = vmul.f32 %v362_v39, %v362_v39 }
  0xf9   : > { %v465_v42 = vpop.f32.mrb[5].mxu1  ;;  %v550_v4 = vmul.f32 %v463_v40, %v463_v40  ;;  %v491_v9 = vmul.f32 %v364_v41, %v364_v41 }
  0xfa   : > { %v551_v23 = vmul.f32 %v465_v42, %v465_v42 }
  0xfb   : > { %v368_v43 = vpop.f32.mrb[6].mxu0 }
  0xfc   : > { %v492_v45 = vmul.f32 %v368_v43, %v368_v43  ;;  %v469_v46 = vpop.f32.mrb[6].mxu1  ;;  %v370_v47 = vpop.f32.mrb[7].mxu0 }
  0xfd   : > { %v552_v50 = vmul.f32 %v469_v46, %v469_v46  ;;  %v493_v51 = vmul.f32 %v370_v47, %v370_v47  ;;  %v471_v52 = vpop.f32.mrb[7].mxu1 }
  0xfe   : > { %v1085_v54 = vadd.f32 %v492_v45, %v486_v44  ;;  %v553_v55 = vmul.f32 %v471_v52, %v471_v52 }
  0xff   : > { %v1087_v56 = vadd.f32 %v552_v50, %v546_v48  ;;  %v1089_v57 = vadd.f32 %v493_v51, %v487_v49  ;;  %v374_v58 = vpop.f32.mrb[8].mxu0 }
 0x100   : > { %923 = vrsqrt.f32 %v1085_v54  ;;  %v1092_v59 = vadd.f32 %v553_v55, %v547_v53  ;;  %v475_v60 = vpop.f32.mrb[8].mxu1  ;;  %v376_v61 = vpop.f32.mrb[9].mxu0  ;;  %v494_v5 = vmul.f32 %v374_v58, %v374_v58  ;;  %vm506_vm1 = vcmp.eq.f32.partialorder %v1085_v54, inf }
 0x101   : > { %v477_v1 = vpop.f32.mrb[9].mxu1  ;;  %925 = vrsqrt.f32 %v1087_v56  ;;  %v554_v6 = vmul.f32 %v475_v60, %v475_v60  ;;  %v495_v7 = vmul.f32 %v376_v61, %v376_v61  ;;  %v509_v32 = vand.u32 2147483648, %v1085_v54 }
 0x102   : > { %927 = vrsqrt.f32 %v1089_v57  ;;  %v555_v10 = vmul.f32 %v477_v1, %v477_v1  ;;  %v1097_v14 = vadd.f32 %v494_v5, %v488_v62  ;;  %vm566_vm2 = vcmp.eq.f32.partialorder %v1087_v56, inf }
 0x103   : > { %v380_v8 = vpop.f32.mrb[10].mxu0  ;;  %929 = vrsqrt.f32 %v1092_v59  ;;  %v1099_v15 = vadd.f32 %v554_v6, %v548_v63  ;;  %v1101_v16 = vadd.f32 %v495_v7, %v489_v0  ;;  %v569_v33 = vand.u32 2147483648, %v1087_v56 }
 0x104   : > { %v496_v11 = vmul.f32 %v380_v8, %v380_v8  ;;  %v481_v12 = vpop.f32.mrb[10].mxu1  ;;  %v382_v13 = vpop.f32.mrb[11].mxu0  ;;  %v1103_v19 = vadd.f32 %v555_v10, %v549_v2  ;;  %931 = vrsqrt.f32 %v1097_v14  ;;  %vm513_vm3 = vcmp.eq.f32.partialorder %v1089_v57, inf }
 0x105   : > { %v556_v17 = vmul.f32 %v481_v12, %v481_v12  ;;  %v483_v18 = vpop.f32.mrb[11].mxu1  ;;  %v497_v21 = vmul.f32 %v382_v13, %v382_v13  ;;  %933 = vrsqrt.f32 %v1101_v16  ;;  %v516_v34 = vand.u32 2147483648, %v1089_v57 }
 0x106   : > { %v1105_v20 = vadd.f32 %v496_v11, %v490_v3  ;;  %v557_v22 = vmul.f32 %v483_v18, %v483_v18  ;;  %vm573_vm4 = vcmp.eq.f32.partialorder %v1092_v59, inf  ;;  %v576_v39 = vand.u32 2147483648, %v1092_v59 }
 0x107   : > { %v1108_v24 = vadd.f32 %v556_v17, %v550_v4  ;;  %v1110_v25 = vadd.f32 %v497_v21, %v491_v9  ;;  %vm508_vm5 = vcmp.eq.f32.partialorder %v1085_v54, 0.0  ;;  %vm515_vm6 = vcmp.eq.f32.partialorder %v1089_v57, 0.0 }
 0x108   : > { %v1113_v26 = vadd.f32 %v557_v22, %v551_v23  ;;  %935 = vrsqrt.f32 %v1105_v20  ;;  %vm520_vm7 = vcmp.eq.f32.partialorder %v1097_v14, inf  ;;  %v523_v43 = vand.u32 2147483648, %v1097_v14 }
 0x109   : > { %937 = vrsqrt.f32 %v1099_v15  ;;  %v583_v44 = vand.u32 2147483648, %v1099_v15  ;;  %vm522_vm8 = vcmp.eq.f32.partialorder %v1097_v14, 0.0  ;;  %vm527_vm9 = vcmp.eq.f32.partialorder %v1101_v16, inf }
 0x10a   : > { %v924_v27 = vpop.eup %923  ;;  %939 = vrsqrt.f32 %v1110_v25  ;;  %vm529_vm10 = vcmp.eq.f32.partialorder %v1101_v16, 0.0  ;;  %v530_v46 = vand.u32 2147483648, %v1101_v16  ;;  %vm580_vm11 = vcmp.eq.f32.partialorder %v1099_v15, inf }
 0x10b   : > { %v926_v28 = vpop.eup %925  ;;  %v505_v29 = vmul.f32 %v924_v27, %v1085_v54  ;;  %941 = vrsqrt.f32 %v1103_v19  ;;  %vm534_vm12 = vcmp.eq.f32.partialorder %v1105_v20, inf  ;;  %vm536_vm13 = vcmp.eq.f32.partialorder %v1105_v20, 0.0 }
 0x10c   : > { %v928_v30 = vpop.eup %927  ;;  %943 = vrsqrt.f32 %v1108_v24  ;;  %v565_v37 = vmul.f32 %v926_v28, %v1087_v56  ;;  %v537_v53 = vand.u32 2147483648, %v1105_v20  ;;  %vm541_vm14 = vcmp.eq.f32.partialorder %v1110_v25, inf }
 0x10d   : > { %v930_v31 = vpop.eup %929  ;;  %945 = vrsqrt.f32 %v1113_v26  ;;  %v507_v35 = vsel %vm506_vm1, %v1085_v54, %v505_v29  ;;  %v512_v38 = vmul.f32 %v928_v30, %v1089_v57  ;;  %v544_v60 = vand.u32 2147483648, %v1110_v25 }
 0x10e   : > { %v932_v36 = vpop.eup %931  ;;  %v572_v40 = vmul.f32 %v930_v31, %v1092_v59  ;;  %v1140_v45 = vsel %vm508_vm5, %v509_v32, %v507_v35  ;;  %v567_v50 = vsel %vm566_vm2, %v1087_v56, %v565_v37  ;;  %vm568_vm15 = vcmp.eq.f32.partialorder %v1087_v56, 0.0 }
 0x10f   : > { %v519_v41 = vmul.f32 %v932_v36, %v1097_v14  ;;  %v934_v42 = vpop.eup %933  ;;  %v514_v49 = vsel %vm513_vm3, %v1089_v57, %v512_v38  ;;  %v612_v55 = vadd.f32 1.0, %v1140_v45  ;;  %vm575_vm0 = vcmp.eq.f32.partialorder %v1092_v59, 0.0 }
 0x110   : > { %v526_v48 = vmul.f32 %v934_v42, %v1101_v16  ;;  %v574_v54 = vsel %vm573_vm4, %v1092_v59, %v572_v40  ;;  %v1168_v62 = vsel %vm515_vm6, %v516_v34, %v514_v49  ;;  %vm543_vm1 = vcmp.eq.f32.partialorder %v1110_v25, 0.0 }
 0x111   : > { %v521_v52 = vsel %vm520_vm7, %v1097_v14, %v519_v41  ;;  %v1172_v0 = vsel %vm568_vm15, %v569_v33, %v567_v50  ;;  %vm582_vm2 = vcmp.eq.f32.partialorder %v1099_v15, 0.0  ;;  %v1182_v57 = vsel %vm575_vm0, %v576_v39, %v574_v54 }
 0x112   : > { %v936_v47 = vpop.eup %935  ;;  %v1177_v2 = vsel %vm522_vm8, %v523_v43, %v521_v52  ;;  %v528_v56 = vsel %vm527_vm9, %v1101_v16, %v526_v48  ;;  %vm587_vm3 = vcmp.eq.f32.partialorder %v1103_v19, inf  ;;  %vm589_vm4 = vcmp.eq.f32.partialorder %v1103_v19, 0.0 }
 0x113   : > { %v938_v51 = vpop.eup %937  ;;  %v533_v63 = vmul.f32 %v936_v47, %v1105_v20  ;;  %v590_v5 = vand.u32 2147483648, %v1103_v19  ;;  %947 = vlog2.f32 %v612_v55  ;;  %vm594_vm5 = vcmp.eq.f32.partialorder %v1108_v24, inf }
 0x114   : > { %v940_v58 = vpop.eup %939  ;;  %v579_v3 = vmul.f32 %v938_v51, %v1099_v15  ;;  %v597_v6 = vand.u32 2147483648, %v1108_v24  ;;  %v615_v7 = vmul.f32 -0.5, %v1140_v45  ;;  %v621_v8 = vadd.f32 1.0, %v1168_v62 }
 0x115   : > { %v942_v61 = vpop.eup %941  ;;  %v540_v4 = vmul.f32 %v940_v58, %v1110_v25  ;;  %v1196_v10 = vsel %vm529_vm10, %v530_v46, %v528_v56  ;;  %v535_v11 = vsel %vm534_vm12, %v1105_v20, %v533_v63  ;;  %vm596_vm6 = vcmp.eq.f32.partialorder %v1108_v24, 0.0 }
 0x116   : > { %v944_v1 = vpop.eup %943  ;;  %v586_v9 = vmul.f32 %v942_v61, %v1103_v19  ;;  %v630_v12 = vadd.f32 1.0, %v1177_v2  ;;  %vm601_vm7 = vcmp.eq.f32.partialorder %v1113_v26, inf  ;;  %vm603_vm8 = vcmp.eq.f32.partialorder %v1113_v26, 0.0 }
 0x117   : > { %v946_v59 = vpop.eup %945  ;;  %v593_v13 = vmul.f32 %v944_v1, %v1108_v24  ;;  %v542_v16 = vsel %vm541_vm14, %v1110_v25, %v540_v4  ;;  %v581_v17 = vsel %vm580_vm11, %v1099_v15, %v579_v3  ;;  %v618_v18 = vand.u32 2147483647, %v1140_v45 }
 0x118   : > { %v600_v14 = vmul.f32 %v946_v59, %v1113_v26  ;;  %v624_v21 = vmul.f32 -0.5, %v1168_v62  ;;  %v1217_v22 = vsel %vm536_vm13, %v537_v53, %v535_v11  ;;  %v616_v23 = vadd.f32 1.0, %v615_v7 }
 0x119   : > { %949 = vlog2.f32 %v621_v8  ;;  %v639_v27 = vadd.f32 1.0, %v1196_v10  ;;  %v588_v28 = vsel %vm587_vm3, %v1103_v19, %v586_v9  ;;  %v604_v29 = vand.u32 2147483648, %v1113_v26 }
 0x11a   : > { %951 = vlog2.f32 %v630_v12  ;;  %v633_v30 = vmul.f32 -0.5, %v1177_v2  ;;  %v1227_v31 = vsel %vm543_vm1, %v544_v60, %v542_v16  ;;  %v1233_v20 = vsel %vm582_vm2, %v583_v44, %v581_v17 }
 0x11b   : > { %v595_v32 = vsel %vm594_vm5, %v1108_v24, %v593_v13  ;;  %v602_v33 = vsel %vm601_vm7, %v1113_v26, %v600_v14  ;;  %vm1241_vm9 = vcmp.lt.f32.partialorder %v618_v18, 0.0004427343  ;;  %v625_v25 = vadd.f32 1.0, %v624_v21 }
 0x11c   : > { %v642_v35 = vmul.f32 -0.5, %v1196_v10  ;;  %v648_v36 = vadd.f32 1.0, %v1217_v22  ;;  %v666_v15 = vadd.f32 1.0, %v1172_v0  ;;  %v1250_v37 = vsel %vm589_vm4, %v590_v5, %v588_v28 }
 0x11d   : > { %v1253_v38 = vmul.f32 %v616_v23, %v1140_v45  ;;  %v627_v39 = vand.u32 2147483647, %v1168_v62  ;;  %953 = vlog2.f32 %v639_v27  ;;  %v948_v40 = vpop.eup %947  ;;  %v634_v41 = vadd.f32 1.0, %v633_v30 }
 0x11e   : > { %v636_v42 = vand.u32 2147483647, %v1177_v2  ;;  %v651_v43 = vmul.f32 -0.5, %v1217_v22  ;;  %955 = vlog2.f32 %v666_v15  ;;  %v1260_v44 = vsel %vm596_vm6, %v597_v6, %v595_v32 }
 0x11f   : > { %v1264_v19 = vsel %vm603_vm8, %v604_v29, %v602_v33  ;;  %v657_v45 = vadd.f32 1.0, %v1227_v31  ;;  %v675_v46 = vadd.f32 1.0, %v1182_v57  ;;  %v1269_v47 = vmul.f32 %v625_v25, %v1168_v62 }
 0x120   : > { %v643_v48 = vadd.f32 1.0, %v642_v35  ;;  %957 = vlog2.f32 %v648_v36  ;;  %v684_v49 = vadd.f32 1.0, %v1233_v20  ;;  %v614_v50 = vmul.f32 0.6931472, %v948_v40 }
 0x121   : > { %vm1272_vm10 = vcmp.lt.f32.partialorder %v627_v39, 0.0004427343  ;;  %v645_v26 = vand.u32 2147483647, %v1196_v10  ;;  %v669_v51 = vmul.f32 -0.5, %v1172_v0  ;;  %959 = vlog2.f32 %v675_v46 }
 0x122   : > { %v1279_v52 = vmul.f32 %v634_v41, %v1177_v2  ;;  %vm1281_vm11 = vcmp.lt.f32.partialorder %v636_v42, 0.0004427343  ;;  %v652_v54 = vadd.f32 1.0, %v651_v43  ;;  %961 = vlog2.f32 %v684_v49 }
 0x123   : > { %v950_v55 = vpop.eup %949  ;;  %963 = vlog2.f32 %v657_v45  ;;  %v660_v58 = vmul.f32 -0.5, %v1227_v31  ;;  %v678_v60 = vmul.f32 -0.5, %v1182_v57  ;;  %v693_v61 = vadd.f32 1.0, %v1250_v37 }
 0x124   : > { %v952_v62 = vpop.eup %951  ;;  %v1289_v63 = vmul.f32 %v643_v48, %v1196_v10  ;;  %v654_v1 = vand.u32 2147483647, %v1217_v22  ;;  %v672_v2 = vand.u32 2147483647, %v1172_v0  ;;  %v681_v56 = vand.u32 2147483647, %v1182_v57 }
 0x125   : > { %v620_v59 = vsel %vm1241_vm9, %v1253_v38, %v614_v50  ;;  %vm1297_vm12 = vcmp.lt.f32.partialorder %v645_v26, 0.0004427343  ;;  %v670_v4 = vadd.f32 1.0, %v669_v51  ;;  %v687_v5 = vmul.f32 -0.5, %v1233_v20 }
 0x126   : > { %965 = vlog2.f32 %v693_v61  ;;  %v623_v6 = vmul.f32 0.6931472, %v950_v55  ;;  %v663_v7 = vand.u32 2147483647, %v1227_v31  ;;  %v696_v8 = vmul.f32 -0.5, %v1250_v37 }
 0x127   : > { %v702_v9 = vadd.f32 1.0, %v1260_v44  ;;  %v954_v10 = vpop.eup %953  ;;  %v632_v11 = vmul.f32 0.6931472, %v952_v62  ;;  %v1306_v12 = vmul.f32 %v652_v54, %v1217_v22  ;;  %v661_v13 = vadd.f32 1.0, %v660_v58 }
 0x128   : > { %v679_v14 = vadd.f32 1.0, %v678_v60  ;;  %v956_v16 = vpop.eup %955  ;;  %vm1308_vm13 = vcmp.lt.f32.partialorder %v672_v2, 0.0004427343  ;;  %vm1312_vm14 = vcmp.lt.f32.partialorder %v681_v56, 0.0004427343  ;;  %v711_v21 = vadd.f32 1.0, %v1264_v19 }
 0x129   : > { %967 = vlog2.f32 %v702_v9  ;;  %vm1317_vm15 = vcmp.lt.f32.partialorder %v654_v1, 0.0004427343  ;;  %v668_v22 = vmul.f32 0.6931472, %v956_v16  ;;  %v671_v27 = vmul.f32 %v670_v4, %v1172_v0 }
 0x12a   : > { %v688_v28 = vadd.f32 1.0, %v687_v5  ;;  %v690_v29 = vand.u32 2147483647, %v1233_v20  ;;  %v958_v30 = vpop.eup %957  ;;  %v629_v32 = vsel %vm1272_vm10, %v1269_v47, %v623_v6  ;;  %v641_v33 = vmul.f32 0.6931472, %v954_v10 }
 0x12b   : > { %v697_v34 = vadd.f32 1.0, %v696_v8  ;;  %969 = vlog2.f32 %v711_v21  ;;  %v960_v25 = vpop.eup %959  ;;  %v638_v35 = vsel %vm1281_vm11, %v1279_v52, %v632_v11  ;;  %v674_v36 = vsel %vm1308_vm13, %v671_v27, %v668_v22 }
 0x12c   : > { %v680_v0 = vmul.f32 %v679_v14, %v1182_v57  ;;  %v705_v15 = vmul.f32 -0.5, %v1260_v44  ;;  %v962_v38 = vpop.eup %961  ;;  %v677_v39 = vmul.f32 0.6931472, %v960_v25  ;;  %v699_v40 = vand.u32 2147483647, %v1250_v37 }
 0x12d   : > { %v714_v41 = vmul.f32 -0.5, %v1264_v19  ;;  %v720_v42 = vsub.f32 %v620_v59, %v674_v36  ;;  %v964_v43 = vpop.eup %963  ;;  %v650_v45 = vmul.f32 0.6931472, %v958_v30  ;;  %v686_v46 = vmul.f32 0.6931472, %v962_v38 }
 0x12e   : > { %v689_v47 = vmul.f32 %v688_v28, %v1233_v20  ;;  %vm691_vm0 = vcmp.lt.f32.partialorder %v690_v29, 0.0004427343  ;;  %v647_v48 = vsel %vm1297_vm12, %v1289_v63, %v641_v33  ;;  %v683_v57 = vsel %vm1312_vm14, %v680_v0, %v677_v39 }
 0x12f   : > { %v698_v49 = vmul.f32 %v697_v34, %v1250_v37  ;;  %v708_v50 = vand.u32 2147483647, %v1260_v44  ;;  %v706_v51 = vadd.f32 1.0, %v705_v15  ;;  %v721_v52 = vsub.f32 %v629_v32, %v683_v57 }
 0x130   : > { %v966_v24 = vpop.eup %965  ;;  %v692_v26 = vsel %vm691_vm0, %v689_v47, %v686_v46  ;;  %v726_v53 = vand.u32 2147483647, %v720_v42  ;;  %v659_v54 = vmul.f32 0.6931472, %v964_v43  ;;  %v715_v20 = vadd.f32 1.0, %v714_v41 }
 0x131   : > { %v695_v55 = vmul.f32 0.6931472, %v966_v24  ;;  %v722_v58 = vsub.f32 %v638_v35, %v692_v26  ;;  %v662_v60 = vmul.f32 %v661_v13, %v1227_v31  ;;  %vm1344_vm1 = vcmp.lt.f32.partialorder %v663_v7, 0.0004427343 }
 0x132   : > { %vm700_vm2 = vcmp.lt.f32.partialorder %v699_v40, 0.0004427343  ;;  %v727_v62 = vand.u32 2147483647, %v721_v52  ;;  %v656_v63 = vsel %vm1317_vm15, %v1306_v12, %v650_v45  ;;  %v717_v2 = vand.u32 2147483647, %v1264_v19 }
 0x133   : > { %v968_v37 = vpop.eup %967  ;;  %v701_v1 = vsel %vm700_vm2, %v698_v49, %v695_v55  ;;  %v728_v56 = vand.u32 2147483647, %v722_v58  ;;  %v707_v3 = vmul.f32 %v706_v51, %v1260_v44  ;;  %v665_v6 = vsel %vm1344_vm1, %v662_v60, %v659_v54 }
 0x134   : > { %v704_v59 = vmul.f32 0.6931472, %v968_v37  ;;  %v723_v4 = vsub.f32 %v647_v48, %v701_v1  ;;  %v753_v31 = vadd.f32 %v727_v62, %v726_v53  ;;  %vm709_vm3 = vcmp.lt.f32.partialorder %v708_v50, 0.0004427343 }
 0x135   : > { %v970_v5 = vpop.eup %969  ;;  %v716_v7 = vmul.f32 %v715_v20, %v1264_v19  ;;  %vm718_vm4 = vcmp.lt.f32.partialorder %v717_v2, 0.0004427343 }
 0x136   : > { %v710_v8 = vsel %vm709_vm3, %v707_v3, %v704_v59  ;;  %v713_v9 = vmul.f32 0.6931472, %v970_v5  ;;  %v729_v10 = vand.u32 2147483647, %v723_v4  ;;  %v754_v11 = vadd.f32 %v753_v31, %v728_v56 }
 0x137   : > { %v724_v12 = vsub.f32 %v656_v63, %v710_v8 }
 0x138   : > { %v719_v13 = vsel %vm718_vm4, %v716_v7, %v713_v9  ;;  %v755_v14 = vadd.f32 %v754_v11, %v729_v10 }
 0x139   : > { %v725_v16 = vsub.f32 %v665_v6, %v719_v13  ;;  %v730_v44 = vand.u32 2147483647, %v724_v12 }
 0x13b   : > { %v731_v17 = vand.u32 2147483647, %v725_v16  ;;  %v756_v18 = vadd.f32 %v755_v14, %v730_v44 }
 0x13d   : > { %v757_v21 = vadd.f32 %v756_v18, %v731_v17 }
 0x13f   : > { %758 = vadd.xlane.f32.xlu0 %v757_v21 }
 0x1cc   : > { %v759_v23 = vpop.xlane.xlu0 %758 }
 0x1cd   : > { %v760_v22 = vrot.slane %v759_v23, 4 }
 0x1cf   : > { %v761_v27 = vadd.f32 %v760_v22, %v759_v23 }
 0x1d1   : > { %v762_v28 = vrot.slane %v761_v27, 2 }
 0x1d3   : > { %v763_v19 = vadd.f32 %v762_v28, %v761_v27 }
 0x1d5   : > { %v764_v29 = vrot.slane %v763_v19, 1 }
 0x1d7   : > { %v765_v30 = vadd.f32 %v764_v29, %v763_v19 }
 0x1d9   : > { %896 = vpush %v765_v30 }
 0x20a   : > { %s897_s16 = spop %896 }
 0x20b   : > { %v767_v32 = vstv %s897_s16 }
 0x20c   : > { %768 = vst [vmem:[%s232_s11] sm:$0xff] %v767_v32 }
 0x20d PF: > { %s13_s14 = sadd.s32 1, %s993_s14   ;;  %s1389_s12 = smov %s989_s13 }
 0x20e   : > { %p10_p5 = scmp.ge.s32.totalorder %s13_s14, 4   ;;  %s1390_s13 = smov %s1392_s15 }
 0x210   :  { %12 = sbr.rel (!%p10_p5) target bundleno = 2 (0x2), region = 73 }

// kernel: multiscale_spectral_loss.7
= control target key start
LH: loop header
LB: loop body
LE: loop exit
PB: predicated region body
PF: predicated region fallthrough
CT: control target
= control target key end

     0   :  { %s1116_s12 = smov 0   ;;  %s1118_s13 = smov 0   ;;  %s1400_s0 = inlined_call_operand.vmem [shape: f32[2,64,128], index: 0, kind: input, shape index: {}]   ;;  %s1401_s1 = inlined_call_operand.vmem [shape: f32[2,64,128], index: 1, kind: input, shape index: {}]   ;;  %s1402_s2 = inlined_call_operand.vmem [shape: f32[80,64], index: 2, kind: input, shape index: {}]   ;;  %s1403_s3 = inlined_call_operand.vmem [shape: f32[2,8,128], index: 3, kind: output, shape index: {}]  }
   0x1   :  { %s1120_s14 = smov 0  }
   0x2 LB: > { %s25_s15 = sadd.s32 1, %s1090_s13  ;;  %p846_p0 = scmp.ge.s32.totalorder %s1094_s14, 1  ;;  %s1094_s14 = sphi %s1120_s14, %s13_s14   ;;  %s1090_s13 = sphi %s1118_s13, %s1417_s13   ;;  %s1086_s12 = sphi %s1116_s12, %s1416_s12  }
   0x3   : > { %p27_p1 = scmp.ge.s32.totalorder %s25_s15, 2  ;;  %p169_p2 = scmp.lt.s32.totalorder %s1094_s14, 3 }
   0x5   : > { %s1419_s15 = smov (%p27_p1, %s25_s15), 0  ;;  %p170_p3 = pnand %p846_p0, %p169_p2 }
   0x6   : > { %p203_p4 = scmp.lt.s32.totalorder (!%p170_p3), %s1086_s12, 1  ;;  %v248_v0 = vld [vmem:[%s1402_s2] sm:$0xff] (!%p170_p3)  ;;  %vm258_vm0 = vcmask (!%p170_p3), 523264   ;;  %v249_v25 = vld [vmem:[%s1402_s2 + $0x8] sm:$0xff] (!%p170_p3)  ;;  %v250_v26 = vld [vmem:[%s1402_s2 + $0x10] sm:$0xff] (!%p170_p3) }
   0x7   : > { %173 = sbr.rel (%p170_p3) target bundleno = 521 (0x209), region = 32  ;;  %928 = vmatprep.mubr.msk.f32.mxu0 (!%p170_p3), %vm258_vm0, %v248_v0  ;;  %959 = vmatprep.mubr.msk.f32.mxu1 (!%p170_p3), %vm258_vm0, %v248_v0  ;;  %v251_v27 = vld [vmem:[%s1402_s2 + $0x18] sm:$0xff] (!%p170_p3)  ;;  %v252_v28 = vld [vmem:[%s1402_s2 + $0x20] sm:$0xff] (!%p170_p3)  ;;  %v253_v29 = vld [vmem:[%s1402_s2 + $0x28] sm:$0xff] (!%p170_p3) }
   0x8   : > { %v254_v30 = vld [vmem:[%s1402_s2 + $0x30] sm:$0xff] (!%p170_p3)  ;;  %v255_v31 = vld [vmem:[%s1402_s2 + $0x38] sm:$0xff] (!%p170_p3)  ;;  %v256_v32 = vld [vmem:[%s1402_s2 + $0x40] sm:$0xff] (!%p170_p3) }
   0x9   : > { %v257_v33 = vld [vmem:[%s1402_s2 + $0x48] sm:$0xff] (!%p170_p3) }
   0xe   : > { %s1421_s12 = smov (!%p203_p4, %s1086_s12), 1 }
   0xf   : > { %s874_s18 = sshll.u32 %s1421_s12, 6  ;;  %s851_s20 = sshll.u32 %s1421_s12, 3 }
  0x10   : > { %s210_s21 = scalar_lea.vmem %s1400_s0, %s874_s18  ;;  %s218_s24 = scalar_lea.vmem %s1401_s1, %s874_s18 }
  0x11   : > { %v232_v1 = vld [vmem:[%s210_s21] sm:$0xff]  ;;  %v233_v2 = vld [vmem:[%s210_s21 + $0x8] sm:$0xff]  ;;  %v234_v6 = vld [vmem:[%s210_s21 + $0x10] sm:$0xff]  ;;  %s222_s23 = scalar_lea.vmem %s1403_s3, %s851_s20 }
  0x12   : > { %v240_v3 = vld [vmem:[%s218_s24] sm:$0xff]  ;;  %v974_v4 = vpack.c.bf16 %v233_v2, %v232_v1  ;;  %v241_v5 = vld [vmem:[%s218_s24 + $0x8] sm:$0xff]  ;;  %v235_v7 = vld [vmem:[%s210_s21 + $0x18] sm:$0xff] }
  0x13   : > { %v990_v8 = vpack.c.bf16 %v241_v5, %v240_v3  ;;  %v978_v9 = vpack.c.bf16 %v235_v7, %v234_v6  ;;  %v242_v10 = vld [vmem:[%s218_s24 + $0x10] sm:$0xff]  ;;  %v243_v11 = vld [vmem:[%s218_s24 + $0x18] sm:$0xff]  ;;  %v236_v12 = vld [vmem:[%s210_s21 + $0x20] sm:$0xff] }
  0x14   : > { %975 = vmatprep.subr.bf16.mxu0 %v974_v4  ;;  %v994_v13 = vpack.c.bf16 %v243_v11, %v242_v10  ;;  %v237_v14 = vld [vmem:[%s210_s21 + $0x28] sm:$0xff]  ;;  %v244_v15 = vld [vmem:[%s218_s24 + $0x20] sm:$0xff]  ;;  %v238_v19 = vld [vmem:[%s210_s21 + $0x30] sm:$0xff] }
  0x15   : > { %v245_v16 = vld [vmem:[%s218_s24 + $0x28] sm:$0xff]  ;;  %991 = vmatprep.subr.bf16.mxu1 %v990_v8  ;;  %977 = vmatpush3.bf16.msra.mxu0 %v974_v4  ;;  %v982_v17 = vpack.c.bf16 %v237_v14, %v236_v12  ;;  %v239_v20 = vld [vmem:[%s210_s21 + $0x38] sm:$0xff]  ;;  %v246_v21 = vld [vmem:[%s218_s24 + $0x30] sm:$0xff] }
  0x16   : > { %993 = vmatpush3.bf16.msra.mxu1 %v990_v8  ;;  %979 = vmatprep.subr.bf16.mxu0 %v978_v9  ;;  %v998_v18 = vpack.c.bf16 %v245_v16, %v244_v15  ;;  %v247_v22 = vld [vmem:[%s218_s24 + $0x38] sm:$0xff]  ;;  %v986_v23 = vpack.c.bf16 %v239_v20, %v238_v19 }
  0x17   : > { %995 = vmatprep.subr.bf16.mxu1 %v994_v13  ;;  %v1002_v24 = vpack.c.bf16 %v247_v22, %v246_v21 }
  0x19   : > { %981 = vmatpush3.bf16.msra.mxu0 %v978_v9 }
  0x1a   : > { %997 = vmatpush3.bf16.msra.mxu1 %v994_v13  ;;  %983 = vmatprep.subr.bf16.mxu0 %v982_v17 }
  0x1b   : > { %999 = vmatprep.subr.bf16.mxu1 %v998_v18 }
  0x1d   : > { %985 = vmatpush3.bf16.msra.mxu0 %v982_v17 }
  0x1e   : > { %1001 = vmatpush3.bf16.msra.mxu1 %v998_v18  ;;  %987 = vmatprep.subr.bf16.mxu0 %v986_v23 }
  0x1f   : > { %1003 = vmatprep.subr.bf16.mxu1 %v1002_v24 }
  0x21   : > { %989 = vmatpush3.bf16.msra.mxu0 %v986_v23 }
  0x22   : > { %1005 = vmatpush3.bf16.msra.mxu1 %v1002_v24 }
  0x24   : > { %929 = vmatmul.mubr.msk.f32.vlgmr.msra.gmra.mrb[0].mxu0 %vm258_vm0, %v249_v25 }
  0x25   : > { %960 = vmatmul.mubr.msk.f32.vlgmr.msra.gmra.mrb[0].mxu1 %vm258_vm0, %v249_v25  ;;  %931 = vmatprep.mubr.msk.f32.mxu0 %vm258_vm0, %v250_v26 }
  0x26   : > { %962 = vmatprep.mubr.msk.f32.mxu1 %vm258_vm0, %v250_v26 }
  0x28   : > { %932 = vmatmul.mubr.msk.f32.gmra.mrb[2].mxu0 %vm258_vm0, %v251_v27 }
  0x29   : > { %963 = vmatmul.mubr.msk.f32.gmra.mrb[2].mxu1 %vm258_vm0, %v251_v27  ;;  %934 = vmatprep.mubr.msk.f32.mxu0 %vm258_vm0, %v252_v28 }
  0x2a   : > { %965 = vmatprep.mubr.msk.f32.mxu1 %vm258_vm0, %v252_v28 }
  0x2c   : > { %935 = vmatmul.mubr.msk.f32.gmra.mrb[4].mxu0 %vm258_vm0, %v253_v29 }
  0x2d   : > { %966 = vmatmul.mubr.msk.f32.gmra.mrb[4].mxu1 %vm258_vm0, %v253_v29  ;;  %937 = vmatprep.mubr.msk.f32.mxu0 %vm258_vm0, %v254_v30 }
  0x2e   : > { %968 = vmatprep.mubr.msk.f32.mxu1 %vm258_vm0, %v254_v30 }
  0x30   : > { %938 = vmatmul.mubr.msk.f32.gmra.mrb[6].mxu0 %vm258_vm0, %v255_v31 }
  0x31   : > { %969 = vmatmul.mubr.msk.f32.gmra.mrb[6].mxu1 %vm258_vm0, %v255_v31  ;;  %940 = vmatprep.mubr.msk.f32.mxu0 %vm258_vm0, %v256_v32 }
  0x32   : > { %971 = vmatprep.mubr.msk.f32.mxu1 %vm258_vm0, %v256_v32 }
  0x34   : > { %941 = vmatmul.mubr.msk.f32.gmra.mrb[8].mxu0 %vm258_vm0, %v257_v33 }
  0x35   : > { %972 = vmatmul.mubr.msk.f32.gmra.mrb[8].mxu1 %vm258_vm0, %v257_v33 }
  0xf7   : > { %v930_v34 = vpop.f32.mrb[0].mxu0 }
  0xf8   : > { %v961_v35 = vpop.f32.mrb[0].mxu1  ;;  %v355_v36 = vpop.f32.mrb[1].mxu0  ;;  %v520_v57 = vmul.f32 %v930_v34, %v930_v34 }
  0xf9   : > { %v470_v37 = vpop.f32.mrb[1].mxu1  ;;  %v519_v43 = vmul.f32 %v355_v36, %v355_v36  ;;  %v570_v61 = vmul.f32 %v961_v35, %v961_v35 }
  0xfa   : > { %v569_v47 = vmul.f32 %v470_v37, %v470_v37 }
  0xfb   : > { %v933_v38 = vpop.f32.mrb[2].mxu0 }
  0xfc   : > { %v964_v39 = vpop.f32.mrb[2].mxu1  ;;  %v365_v40 = vpop.f32.mrb[3].mxu0  ;;  %v522_v13 = vmul.f32 %v933_v38, %v933_v38 }
  0xfd   : > { %v480_v41 = vpop.f32.mrb[3].mxu1  ;;  %v521_v53 = vmul.f32 %v365_v40, %v365_v40  ;;  %v572_v16 = vmul.f32 %v964_v39, %v964_v39 }
  0xfe   : > { %v571_v58 = vmul.f32 %v480_v41, %v480_v41 }
  0xff   : > { %v936_v42 = vpop.f32.mrb[4].mxu0 }
 0x100   : > { %v524_v44 = vmul.f32 %v936_v42, %v936_v42  ;;  %v967_v45 = vpop.f32.mrb[4].mxu1  ;;  %v375_v46 = vpop.f32.mrb[5].mxu0 }
 0x101   : > { %v574_v48 = vmul.f32 %v967_v45, %v967_v45  ;;  %v490_v49 = vpop.f32.mrb[5].mxu1  ;;  %v523_v8 = vmul.f32 %v375_v46, %v375_v46 }
 0x102   : > { %v1193_v50 = vadd.f32 %v524_v44, %v519_v43  ;;  %v573_v9 = vmul.f32 %v490_v49, %v490_v49 }
 0x103   : > { %v1195_v51 = vadd.f32 %v574_v48, %v569_v47  ;;  %v939_v52 = vpop.f32.mrb[6].mxu0 }
 0x104   : > { %1032 = vrsqrt.f32 %v1193_v50  ;;  %v526_v54 = vmul.f32 %v939_v52, %v939_v52  ;;  %v970_v55 = vpop.f32.mrb[6].mxu1  ;;  %v385_v56 = vpop.f32.mrb[7].mxu0  ;;  %vm536_vm1 = vcmp.eq.f32.partialorder %v1193_v50, inf  ;;  %v539_v24 = vand.u32 2147483648, %v1193_v50 }
 0x105   : > { %v576_v59 = vmul.f32 %v970_v55, %v970_v55  ;;  %v500_v60 = vpop.f32.mrb[7].mxu1  ;;  %v525_v63 = vmul.f32 %v385_v56, %v385_v56  ;;  %1034 = vrsqrt.f32 %v1195_v51  ;;  %vm586_vm2 = vcmp.eq.f32.partialorder %v1195_v51, inf }
 0x106   : > { %v1198_v62 = vadd.f32 %v526_v54, %v521_v53  ;;  %v575_v0 = vmul.f32 %v500_v60, %v500_v60  ;;  %v589_v26 = vand.u32 2147483648, %v1195_v51  ;;  %vm538_vm3 = vcmp.eq.f32.partialorder %v1193_v50, 0.0 }
 0x107   : > { %v1201_v1 = vadd.f32 %v576_v59, %v571_v58  ;;  %v942_v2 = vpop.f32.mrb[8].mxu0  ;;  %v530_v3 = vadd.f32 %v525_v63, %v520_v57  ;;  %vm588_vm6 = vcmp.eq.f32.partialorder %v1195_v51, 0.0 }
 0x108   : > { %1036 = vrsqrt.f32 %v1198_v62  ;;  %v1204_v4 = vadd.f32 %v575_v0, %v570_v61  ;;  %v528_v5 = vmul.f32 %v942_v2, %v942_v2  ;;  %v973_v6 = vpop.f32.mrb[8].mxu1  ;;  %v395_v7 = vpop.f32.mrb[9].mxu0  ;;  %vm550_vm5 = vcmp.eq.f32.partialorder %v1198_v62, inf }
 0x109   : > { %v578_v10 = vmul.f32 %v973_v6, %v973_v6  ;;  %v527_v11 = vmul.f32 %v395_v7, %v395_v7  ;;  %v510_v12 = vpop.f32.mrb[9].mxu1  ;;  %1038 = vrsqrt.f32 %v530_v3  ;;  %vm543_vm4 = vcmp.eq.f32.partialorder %v530_v3, inf }
 0x10a   : > { %v1206_v14 = vadd.f32 %v528_v5, %v523_v8  ;;  %1040 = vrsqrt.f32 %v1204_v4  ;;  %v577_v18 = vmul.f32 %v510_v12, %v510_v12  ;;  %v546_v29 = vand.u32 2147483648, %v530_v3 }
 0x10b   : > { %v1208_v15 = vadd.f32 %v578_v10, %v573_v9  ;;  %v1211_v17 = vadd.f32 %v527_v11, %v522_v13  ;;  %vm593_vm7 = vcmp.eq.f32.partialorder %v1204_v4, inf  ;;  %v596_v32 = vand.u32 2147483648, %v1204_v4 }
 0x10c   : > { %1042 = vrsqrt.f32 %v1206_v14  ;;  %v1215_v20 = vadd.f32 %v577_v18, %v572_v16  ;;  %vm545_vm8 = vcmp.eq.f32.partialorder %v530_v3, 0.0  ;;  %vm552_vm9 = vcmp.eq.f32.partialorder %v1198_v62, 0.0 }
 0x10d   : > { %1044 = vrsqrt.f32 %v1201_v1  ;;  %v553_v35 = vand.u32 2147483648, %v1198_v62  ;;  %vm564_vm10 = vcmp.eq.f32.partialorder %v1206_v14, inf  ;;  %vm557_vm11 = vcmp.eq.f32.partialorder %v1211_v17, inf }
 0x10e   : > { %v1033_v19 = vpop.eup %1032  ;;  %1046 = vrsqrt.f32 %v1211_v17  ;;  %vm566_vm12 = vcmp.eq.f32.partialorder %v1206_v14, 0.0  ;;  %vm559_vm13 = vcmp.eq.f32.partialorder %v1211_v17, 0.0  ;;  %v560_v44 = vand.u32 2147483648, %v1211_v17 }
 0x10f   : > { %v535_v21 = vmul.f32 %v1033_v19, %v1193_v50  ;;  %v1035_v22 = vpop.eup %1034  ;;  %1048 = vrsqrt.f32 %v1215_v20  ;;  %v567_v45 = vand.u32 2147483648, %v1206_v14  ;;  %vm595_vm14 = vcmp.eq.f32.partialorder %v1204_v4, 0.0 }
 0x110   : > { %1050 = vrsqrt.f32 %v1208_v15  ;;  %v585_v30 = vmul.f32 %v1035_v22, %v1195_v51  ;;  %vm600_vm15 = vcmp.eq.f32.partialorder %v1201_v1, inf  ;;  %vm602_vm0 = vcmp.eq.f32.partialorder %v1201_v1, 0.0 }
 0x111   : > { %v537_v25 = vsel %vm536_vm1, %v1193_v50, %v535_v21  ;;  %v603_v58 = vand.u32 2147483648, %v1201_v1  ;;  %vm607_vm1 = vcmp.eq.f32.partialorder %v1215_v20, inf  ;;  %v610_v5 = vand.u32 2147483648, %v1215_v20 }
 0x112   : > { %v1037_v23 = vpop.eup %1036  ;;  %v1233_v33 = vsel %vm538_vm3, %v539_v24, %v537_v25  ;;  %v587_v46 = vsel %vm586_vm2, %v1195_v51, %v585_v30  ;;  %vm609_vm2 = vcmp.eq.f32.partialorder %v1215_v20, 0.0  ;;  %vm614_vm3 = vcmp.eq.f32.partialorder %v1208_v15, inf }
 0x113   : > { %v549_v27 = vmul.f32 %v1037_v23, %v1198_v62  ;;  %v1039_v28 = vpop.eup %1038  ;;  %v624_v42 = vadd.f32 1.0, %v1233_v33  ;;  %v1270_v57 = vsel %vm588_vm6, %v589_v26, %v587_v46  ;;  %v627_v63 = vmul.f32 -0.5, %v1233_v33 }
 0x114   : > { %v542_v31 = vmul.f32 %v1039_v28, %v530_v3  ;;  %v1041_v34 = vpop.eup %1040  ;;  %v630_v6 = vand.u32 2147483647, %v1233_v33  ;;  %v672_v25 = vmul.f32 -0.5, %v1270_v57 }
 0x115   : > { %v551_v38 = vsel %vm550_vm5, %v1198_v62, %v549_v27  ;;  %v592_v47 = vmul.f32 %v1041_v34, %v1204_v4  ;;  %1052 = vlog2.f32 %v624_v42  ;;  %v628_v13 = vadd.f32 1.0, %v627_v63 }
 0x116   : > { %v1043_v36 = vpop.eup %1042  ;;  %v544_v37 = vsel %vm543_vm4, %v530_v3, %v542_v31  ;;  %v1255_v48 = vsel %vm552_vm9, %v553_v35, %v551_v38  ;;  %v669_v3 = vadd.f32 1.0, %v1270_v57  ;;  %vm616_vm4 = vcmp.eq.f32.partialorder %v1208_v15, 0.0 }
 0x117   : > { %v1045_v39 = vpop.eup %1044  ;;  %v1241_v40 = vsel %vm545_vm8, %v546_v29, %v544_v37  ;;  %v563_v41 = vmul.f32 %v1043_v36, %v1206_v14  ;;  %v642_v60 = vadd.f32 1.0, %v1255_v48  ;;  %v594_v51 = vsel %vm593_vm7, %v1204_v4, %v592_v47 }
 0x118   : > { %v1047_v43 = vpop.eup %1046  ;;  %v599_v52 = vmul.f32 %v1045_v39, %v1201_v1  ;;  %v633_v54 = vadd.f32 1.0, %v1241_v40  ;;  %v1300_v8 = vsel %vm595_vm14, %v596_v32, %v594_v51  ;;  %v636_v9 = vmul.f32 -0.5, %v1241_v40 }
 0x119   : > { %v556_v49 = vmul.f32 %v1047_v43, %v1211_v17  ;;  %v1049_v50 = vpop.eup %1048  ;;  %v565_v53 = vsel %vm564_vm10, %v1206_v14, %v563_v41  ;;  %v617_v14 = vand.u32 2147483648, %v1208_v15  ;;  %v645_v16 = vmul.f32 -0.5, %v1255_v48 }
 0x11a   : > { %v1051_v55 = vpop.eup %1050  ;;  %v1282_v61 = vsel %vm566_vm12, %v567_v45, %v565_v53  ;;  %v606_v62 = vmul.f32 %v1049_v50, %v1215_v20  ;;  %v601_v0 = vsel %vm600_vm15, %v1201_v1, %v599_v52  ;;  %1054 = vlog2.f32 %v633_v54 }
 0x11b   : > { %v558_v56 = vsel %vm557_vm11, %v1211_v17, %v556_v49  ;;  %v613_v2 = vmul.f32 %v1051_v55, %v1208_v15  ;;  %1056 = vlog2.f32 %v642_v60  ;;  %v660_v10 = vadd.f32 1.0, %v1282_v61 }
 0x11c   : > { %v1275_v59 = vsel %vm559_vm13, %v560_v44, %v558_v56  ;;  %v1306_v11 = vsel %vm602_vm0, %v603_v58, %v601_v0  ;;  %v608_v12 = vsel %vm607_vm1, %v1215_v20, %v606_v62  ;;  %1058 = vlog2.f32 %v669_v3 }
 0x11d   : > { %v651_v7 = vadd.f32 1.0, %v1275_v59  ;;  %v615_v4 = vsel %vm614_vm3, %v1208_v15, %v613_v2  ;;  %vm1315_vm5 = vcmp.lt.f32.partialorder %v630_v6, 0.0004427343  ;;  %v639_v1 = vand.u32 2147483647, %v1241_v40 }
 0x11e   : > { %v678_v18 = vadd.f32 1.0, %v1300_v8  ;;  %v1323_v19 = vsel %vm609_vm2, %v610_v5, %v608_v12  ;;  %v637_v21 = vadd.f32 1.0, %v636_v9  ;;  %v687_v15 = vadd.f32 1.0, %v1306_v11 }
 0x11f   : > { %1060 = vlog2.f32 %v651_v7  ;;  %v1053_v22 = vpop.eup %1052  ;;  %v1326_v23 = vsel %vm616_vm4, %v617_v14, %v615_v4  ;;  %v629_v24 = vmul.f32 %v628_v13, %v1233_v33  ;;  %v646_v26 = vadd.f32 1.0, %v645_v16 }
 0x120   : > { %1062 = vlog2.f32 %v660_v10  ;;  %v648_v27 = vand.u32 2147483647, %v1255_v48  ;;  %v654_v28 = vmul.f32 -0.5, %v1275_v59  ;;  %vm1332_vm6 = vcmp.lt.f32.partialorder %v639_v1, 0.0004427343 }
 0x121   : > { %1064 = vlog2.f32 %v678_v18  ;;  %v657_v29 = vand.u32 2147483647, %v1275_v59  ;;  %v681_v30 = vmul.f32 -0.5, %v1300_v8  ;;  %v696_v31 = vadd.f32 1.0, %v1323_v19 }
 0x122   : > { %1066 = vlog2.f32 %v687_v15  ;;  %v626_v33 = vmul.f32 0.6931472, %v1053_v22  ;;  %v638_v34 = vmul.f32 %v637_v21, %v1241_v40  ;;  %v663_v35 = vmul.f32 -0.5, %v1282_v61 }
 0x123   : > { %v666_v36 = vand.u32 2147483647, %v1282_v61  ;;  %v673_v37 = vadd.f32 1.0, %v672_v25  ;;  %v690_v38 = vmul.f32 -0.5, %v1306_v11  ;;  %1068 = vlog2.f32 %v696_v31 }
 0x124   : > { %v1055_v32 = vpop.eup %1054  ;;  %v705_v39 = vadd.f32 1.0, %v1326_v23  ;;  %v647_v42 = vmul.f32 %v646_v26, %v1255_v48  ;;  %vm1345_vm7 = vcmp.lt.f32.partialorder %v648_v27, 0.0004427343  ;;  %v655_v44 = vadd.f32 1.0, %v654_v28 }
 0x125   : > { %v1057_v41 = vpop.eup %1056  ;;  %v675_v40 = vand.u32 2147483647, %v1270_v57  ;;  %v635_v45 = vmul.f32 0.6931472, %v1055_v32  ;;  %v682_v46 = vadd.f32 1.0, %v681_v30  ;;  %v632_v50 = vsel %vm1315_vm5, %v629_v24, %v626_v33 }
 0x126   : > { %v684_v47 = vand.u32 2147483647, %v1300_v8  ;;  %1070 = vlog2.f32 %v705_v39  ;;  %v1059_v49 = vpop.eup %1058  ;;  %vm1353_vm8 = vcmp.lt.f32.partialorder %v657_v29, 0.0004427343  ;;  %v664_v48 = vadd.f32 1.0, %v663_v35 }
 0x127   : > { %v699_v53 = vmul.f32 -0.5, %v1323_v19  ;;  %v644_v55 = vmul.f32 0.6931472, %v1057_v41  ;;  %vm1358_vm9 = vcmp.lt.f32.partialorder %v666_v36, 0.0004427343  ;;  %v674_v60 = vmul.f32 %v673_v37, %v1270_v57 }
 0x128   : > { %v671_v58 = vmul.f32 0.6931472, %v1059_v49  ;;  %v691_v51 = vadd.f32 1.0, %v690_v38  ;;  %v656_v63 = vmul.f32 %v655_v44, %v1275_v59  ;;  %vm676_vm10 = vcmp.lt.f32.partialorder %v675_v40, 0.0004427343 }
 0x129   : > { %v1061_v54 = vpop.eup %1060  ;;  %v693_v0 = vand.u32 2147483647, %v1306_v11  ;;  %v708_v2 = vmul.f32 -0.5, %v1326_v23  ;;  %v641_v5 = vsel %vm1332_vm6, %v638_v34, %v635_v45  ;;  %v683_v7 = vmul.f32 %v682_v46, %v1300_v8 }
 0x12a   : > { %v1063_v62 = vpop.eup %1062  ;;  %v677_v6 = vsel %vm676_vm10, %v674_v60, %v671_v58  ;;  %vm1369_vm11 = vcmp.lt.f32.partialorder %v684_v47, 0.0004427343  ;;  %v653_v10 = vmul.f32 0.6931472, %v1061_v54  ;;  %v700_v59 = vadd.f32 1.0, %v699_v53 }
 0x12b   : > { %v1065_v3 = vpop.eup %1064  ;;  %v714_v13 = vsub.f32 %v632_v50, %v677_v6  ;;  %v650_v4 = vsel %vm1345_vm7, %v647_v42, %v644_v55  ;;  %v692_v16 = vmul.f32 %v691_v51, %v1306_v11  ;;  %v702_v17 = vand.u32 2147483647, %v1323_v19 }
 0x12c   : > { %v1067_v57 = vpop.eup %1066  ;;  %v680_v12 = vmul.f32 0.6931472, %v1065_v3  ;;  %v662_v1 = vmul.f32 0.6931472, %v1063_v62  ;;  %vm694_vm12 = vcmp.lt.f32.partialorder %v693_v0, 0.0004427343  ;;  %v665_v15 = vmul.f32 %v664_v48, %v1282_v61 }
 0x12d   : > { %v689_v14 = vmul.f32 0.6931472, %v1067_v57  ;;  %v709_v18 = vadd.f32 1.0, %v708_v2  ;;  %v1069_v21 = vpop.eup %1068  ;;  %v711_v24 = vand.u32 2147483647, %v1326_v23  ;;  %v659_v26 = vsel %vm1353_vm8, %v656_v63, %v653_v10 }
 0x12e   : > { %v686_v8 = vsel %vm1369_vm11, %v683_v7, %v680_v12  ;;  %v698_v27 = vmul.f32 0.6931472, %v1069_v21  ;;  %v701_v11 = vmul.f32 %v700_v59, %v1323_v19  ;;  %vm703_vm13 = vcmp.lt.f32.partialorder %v702_v17, 0.0004427343 }
 0x12f   : > { %v695_v22 = vsel %vm694_vm12, %v692_v16, %v689_v14  ;;  %v715_v25 = vsub.f32 %v641_v5, %v686_v8  ;;  %v719_v29 = vand.u32 2147483647, %v714_v13  ;;  %v668_v31 = vsel %vm1358_vm9, %v665_v15, %v662_v1 }
 0x130   : > { %v716_v28 = vsub.f32 %v650_v4, %v695_v22  ;;  %v1071_v20 = vpop.eup %1070  ;;  %v704_v32 = vsel %vm703_vm13, %v701_v11, %v698_v27  ;;  %v710_v33 = vmul.f32 %v709_v18, %v1326_v23  ;;  %vm712_vm14 = vcmp.lt.f32.partialorder %v711_v24, 0.0004427343 }
 0x131   : > { %v720_v30 = vand.u32 2147483647, %v715_v25  ;;  %v707_v61 = vmul.f32 0.6931472, %v1071_v20  ;;  %v717_v34 = vsub.f32 %v659_v26, %v704_v32 }
 0x132   : > { %v721_v35 = vand.u32 2147483647, %v716_v28 }
 0x133   : > { %v742_v36 = vadd.f32 %v720_v30, %v719_v29  ;;  %v713_v37 = vsel %vm712_vm14, %v710_v33, %v707_v61  ;;  %v722_v19 = vand.u32 2147483647, %v717_v34 }
 0x134   : > { %v718_v38 = vsub.f32 %v668_v31, %v713_v37 }
 0x135   : > { %v743_v39 = vadd.f32 %v742_v36, %v721_v35 }
 0x136   : > { %v723_v41 = vand.u32 2147483647, %v718_v38 }
 0x137   : > { %v744_v42 = vadd.f32 %v743_v39, %v722_v19 }
 0x139   : > { %v745_v43 = vadd.f32 %v744_v42, %v723_v41 }
 0x13b   : > { %746 = vadd.xlane.f32.xlu0 %v745_v43 }
 0x1c8   : > { %v747_v44 = vpop.xlane.xlu0 %746 }
 0x1c9   : > { %v748_v40 = vrot.slane %v747_v44, 4 }
 0x1cb   : > { %v749_v45 = vadd.f32 %v748_v40, %v747_v44 }
 0x1cd   : > { %v750_v46 = vrot.slane %v749_v45, 2 }
 0x1cf   : > { %v751_v47 = vadd.f32 %v750_v46, %v749_v45 }
 0x1d1   : > { %v752_v49 = vrot.slane %v751_v47, 1 }
 0x1d3   : > { %v753_v23 = vadd.f32 %v752_v49, %v751_v47 }
 0x1d5   : > { %1006 = vpush %v753_v23 }
 0x206   : > { %s1007_s24 = spop %1006 }
 0x207   : > { %v755_v50 = vstv %s1007_s24 }
 0x208   : > { %756 = vst [vmem:[%s222_s23] sm:$0xff] %v755_v50 }
 0x209 PF: > { %s13_s14 = sadd.s32 1, %s1094_s14   ;;  %s1416_s12 = smov %s1090_s13 }
 0x20a   : > { %p10_p5 = scmp.ge.s32.totalorder %s13_s14, 4   ;;  %s1417_s13 = smov %s1419_s15 }
 0x20c   :  { %12 = sbr.rel (!%p10_p5) target bundleno = 2 (0x2), region = 73 }

// kernel: multiscale_spectral_loss.5
= control target key start
LH: loop header
LB: loop body
LE: loop exit
PB: predicated region body
PF: predicated region fallthrough
CT: control target
= control target key end

     0   :  { %s1183_s12 = smov 0   ;;  %s1185_s13 = smov 0   ;;  %s1526_s0 = inlined_call_operand.vmem [shape: f32[2,16,384], index: 0, kind: input, shape index: {}]   ;;  %s1527_s1 = inlined_call_operand.vmem [shape: f32[2,16,384], index: 1, kind: input, shape index: {}]   ;;  %s1528_s2 = inlined_call_operand.vmem [shape: f32[32,16], index: 2, kind: input, shape index: {}]   ;;  %s1529_s3 = inlined_call_operand.vmem [shape: f32[2,8,128], index: 3, kind: output, shape index: {}]  }
   0x1   :  { %s1187_s14 = smov 0  }
   0x2 LB: > { %s25_s15 = sadd.s32 1, %s1156_s13  ;;  %p992_p0 = scmp.ge.s32.totalorder %s1160_s14, 1  ;;  %s1160_s14 = sphi %s1187_s14, %s13_s14   ;;  %s1156_s13 = sphi %s1185_s13, %s1549_s13   ;;  %s1152_s12 = sphi %s1183_s12, %s1548_s12  }
   0x3   : > { %p27_p1 = scmp.ge.s32.totalorder %s25_s15, 2  ;;  %p173_p2 = scmp.lt.s32.totalorder %s1160_s14, 3 }
   0x5   : > { %s1551_s15 = smov (%p27_p1, %s25_s15), 0  ;;  %p174_p3 = pnand %p992_p0, %p173_p2 }
   0x6   : > { %p210_p4 = scmp.lt.s32.totalorder (!%p174_p3), %s1152_s12, 1  ;;  %v255_v0 = vld [vmem:[%s1528_s2] sm:$0xff] (!%p174_p3)  ;;  %vm259_vm0 = vcmask (!%p174_p3), 130048   ;;  %v1162_v1 = vmov (!%p174_p3), 0.0   ;;  %v256_v19 = vld [vmem:[%s1528_s2 + $0x8] sm:$0xff] (!%p174_p3)  ;;  %v257_v20 = vld [vmem:[%s1528_s2 + $0x10] sm:$0xff] (!%p174_p3) }
   0x7   : > { %177 = sbr.rel (%p174_p3) target bundleno = 518 (0x206), region = 32  ;;  %336 = vmatprep.mubr.f32.mxu0 (!%p174_p3), %v1162_v1  ;;  %1030 = vmatprep.mubr.msk.f32.mxu1 (!%p174_p3), %vm259_vm0, %v255_v0  ;;  %v258_v22 = vld [vmem:[%s1528_s2 + $0x18] sm:$0xff] (!%p174_p3) }
   0xe   : > { %s1553_s12 = smov (!%p210_p4, %s1152_s12), 1 }
   0xf   : > { %s1062_s18 = smul.u32 48, %s1553_s12  ;;  %s995_s4 = sshll.u32 %s1553_s12, 3 }
  0x10   : > { %s232_s7 = scalar_lea.vmem %s1529_s3, %s995_s4 }
  0x11   : > { %s217_s21 = scalar_lea.vmem %s1526_s0, %s1062_s18  ;;  %s227_s24 = scalar_lea.vmem %s1527_s1, %s1062_s18 }
  0x12   : > { %v244_v2 = vld [vmem:[%s217_s21 + $0x8] sm:$0xff]  ;;  %v247_v3 = vld [vmem:[%s217_s21 + $0x20] sm:$0xff]  ;;  %v245_v4 = vld [vmem:[%s217_s21 + $0x10] sm:$0xff] }
  0x13   : > { %v1046_v5 = vpack.c.bf16 %v247_v3, %v244_v2  ;;  %v248_v6 = vld [vmem:[%s217_s21 + $0x28] sm:$0xff]  ;;  %v243_v7 = vld [vmem:[%s217_s21] sm:$0xff]  ;;  %v246_v8 = vld [vmem:[%s217_s21 + $0x18] sm:$0xff] }
  0x14   : > { %v1050_v9 = vpack.c.bf16 %v248_v6, %v245_v4  ;;  %v1048_v10 = vpack.c.bf16 %v246_v8, %v243_v7  ;;  %v251_v11 = vld [vmem:[%s227_s24 + $0x10] sm:$0xff]  ;;  %v254_v12 = vld [vmem:[%s227_s24 + $0x28] sm:$0xff]  ;;  %v253_v15 = vld [vmem:[%s227_s24 + $0x20] sm:$0xff] }
  0x15   : > { %v250_v13 = vld [vmem:[%s227_s24 + $0x8] sm:$0xff]  ;;  %1047 = vmatprep.subr.bf16.mxu0 %v1046_v5  ;;  %v1058_v14 = vpack.c.bf16 %v254_v12, %v251_v11  ;;  %v249_v16 = vld [vmem:[%s227_s24] sm:$0xff]  ;;  %v252_v17 = vld [vmem:[%s227_s24 + $0x18] sm:$0xff] }
  0x16   : > { %1051 = vmatprep.subr.bf16.mxu1 %v1050_v9  ;;  %1049 = vmatpush1.bf16.msra.mxu0 %v1048_v10  ;;  %v1054_v18 = vpack.c.bf16 %v253_v15, %v250_v13  ;;  %v1056_v21 = vpack.c.bf16 %v252_v17, %v249_v16 }
  0x17   : > { %1053 = vmatpush3.bf16.msra.mxu1 %v1050_v9  ;;  %1059 = vmatprep.subr.bf16.mxu0 %v1058_v14 }
  0x18   : > { %1055 = vmatprep.subr.bf16.mxu1 %v1054_v18 }
  0x19   : > { %996 = vmatmul.mubr.msk.f32.vlgmr.msra.gmra.mrb[0].mxu0 %vm259_vm0, %v255_v0 }
  0x1a   : > { %1031 = vmatmul.mubr.msk.f32.vlgmr.msra.gmra.mrb[0].mxu1 %vm259_vm0, %v256_v19  ;;  %1061 = vmatpush3.bf16.msra.mxu0 %v1058_v14 }
  0x1b   : > { %342 = vmatprep.mubr.f32.mxu0 %v1162_v1  ;;  %1033 = vmatprep.mubr.msk.f32.mxu1 %vm259_vm0, %v257_v20 }
  0x1c   : > { %1057 = vmatpush1.bf16.msra.mxu1 %v1056_v21 }
  0x1d   : > { %997 = vmatmul.mubr.msk.f32.gmra.mrb[2].mxu0 %vm259_vm0, %v256_v19 }
  0x1e   : > { %1034 = vmatmul.mubr.msk.f32.gmra.mrb[2].mxu1 %vm259_vm0, %v258_v22  ;;  %348 = vmatprep.mubr.f32.mxu0 %v1162_v1 }
  0x1f   : > { %510 = vmatprep.mubr.f32.mxu1 %v1162_v1 }
  0x21   : > { %998 = vmatmul.mubr.msk.f32.gmra.mrb[4].mxu0 %vm259_vm0, %v257_v20 }
  0x22   : > { %1004 = vmatmul.mubr.msk.f32.vlgmr.msra.gmra.mrb[4].mxu1 %vm259_vm0, %v255_v0  ;;  %354 = vmatprep.mubr.f32.mxu0 %v1162_v1 }
  0x23   : > { %516 = vmatprep.mubr.f32.mxu1 %v1162_v1 }
  0x25   : > { %999 = vmatmul.mubr.msk.f32.gmra.mrb[6].mxu0 %vm259_vm0, %v258_v22 }
  0x26   : > { %1005 = vmatmul.mubr.msk.f32.gmra.mrb[6].mxu1 %vm259_vm0, %v256_v19  ;;  %1040 = vmatprep.mubr.msk.f32.mxu0 %vm259_vm0, %v255_v0 }
  0x27   : > { %522 = vmatprep.mubr.f32.mxu1 %v1162_v1 }
  0x29   : > { %1041 = vmatmul.mubr.msk.f32.vlgmr.msra.gmra.mrb[8].mxu0 %vm259_vm0, %v256_v19 }
  0x2a   : > { %1006 = vmatmul.mubr.msk.f32.gmra.mrb[8].mxu1 %vm259_vm0, %v257_v20  ;;  %1043 = vmatprep.mubr.msk.f32.mxu0 %vm259_vm0, %v257_v20 }
  0x2b   : > { %528 = vmatprep.mubr.f32.mxu1 %v1162_v1 }
  0x2d   : > { %1044 = vmatmul.mubr.msk.f32.gmra.mrb[10].mxu0 %vm259_vm0, %v258_v22 }
  0x2e   : > { %1007 = vmatmul.mubr.msk.f32.gmra.mrb[10].mxu1 %vm259_vm0, %v258_v22 }
  0xec   : > { %v338_v23 = vpop.f32.mrb[0].mxu0 }
  0xed   : > { %v340_v24 = vpop.f32.mrb[1].mxu0  ;;  %v1032_v25 = vpop.f32.mrb[0].mxu1  ;;  %v620_v37 = vmul.f32 %v338_v23, %v338_v23 }
  0xee   : > { %v427_v26 = vpop.f32.mrb[1].mxu1  ;;  %v625_v30 = vmul.f32 %v1032_v25, %v1032_v25  ;;  %v621_v42 = vmul.f32 %v340_v24, %v340_v24 }
  0xef   : > { %v622_v33 = vmul.f32 %v427_v26, %v427_v26 }
  0xf0   : > { %v344_v27 = vpop.f32.mrb[2].mxu0 }
  0xf1   : > { %v1035_v28 = vpop.f32.mrb[2].mxu1  ;;  %v346_v29 = vpop.f32.mrb[3].mxu0  ;;  %v623_v48 = vmul.f32 %v344_v27, %v344_v27 }
  0xf2   : > { %v631_v31 = vmul.f32 %v1035_v28, %v1035_v28  ;;  %v437_v32 = vpop.f32.mrb[3].mxu1  ;;  %v624_v52 = vmul.f32 %v346_v29, %v346_v29 }
  0xf3   : > { %v628_v34 = vmul.f32 %v437_v32, %v437_v32 }
  0xf4   : > { %v1238_v35 = vadd.f32 %v631_v31, %v625_v30  ;;  %v350_v36 = vpop.f32.mrb[4].mxu0 }
  0xf5   : > { %v1240_v38 = vadd.f32 %v628_v34, %v622_v33  ;;  %v626_v39 = vmul.f32 %v350_v36, %v350_v36  ;;  %v352_v40 = vpop.f32.mrb[5].mxu0  ;;  %v512_v41 = vpop.f32.mrb[4].mxu1 }
  0xf6   : > { %v627_v43 = vmul.f32 %v352_v40, %v352_v40  ;;  %v514_v44 = vpop.f32.mrb[5].mxu1  ;;  %v680_v60 = vmul.f32 %v512_v41, %v512_v41  ;;  %vm675_vm2 = vcmp.eq.f32.partialorder %v1238_v35, inf  ;;  %vm677_vm4 = vcmp.eq.f32.partialorder %v1238_v35, 0.0 }
  0xf7   : > { %v1242_v45 = vadd.f32 %v626_v39, %v620_v37  ;;  %v681_v63 = vmul.f32 %v514_v44, %v514_v44  ;;  %vm654_vm1 = vcmp.eq.f32.partialorder %v1240_v38, inf  ;;  %v657_v25 = vand.u32 2147483648, %v1240_v38 }
  0xf8   : > { %v1244_v46 = vadd.f32 %v627_v43, %v621_v42  ;;  %v356_v47 = vpop.f32.mrb[6].mxu0  ;;  %vm656_vm3 = vcmp.eq.f32.partialorder %v1240_v38, 0.0  ;;  %v678_v36 = vand.u32 2147483648, %v1238_v35 }
  0xf9   : > { %v629_v49 = vmul.f32 %v356_v47, %v356_v47  ;;  %v358_v50 = vpop.f32.mrb[7].mxu0  ;;  %v518_v51 = vpop.f32.mrb[6].mxu1  ;;  %1090 = vrsqrt.f32 %v1242_v45  ;;  %vm640_vm5 = vcmp.eq.f32.partialorder %v1242_v45, inf  ;;  %v643_v28 = vand.u32 2147483648, %v1242_v45 }
  0xfa   : > { %v630_v53 = vmul.f32 %v358_v50, %v358_v50  ;;  %v520_v54 = vpop.f32.mrb[7].mxu1  ;;  %1092 = vrsqrt.f32 %v1244_v46  ;;  %v683_v9 = vmul.f32 %v518_v51, %v518_v51  ;;  %vm647_vm6 = vcmp.eq.f32.partialorder %v1244_v46, inf }
  0xfb   : > { %v1248_v55 = vadd.f32 %v629_v49, %v623_v48  ;;  %1094 = vrsqrt.f32 %v1240_v38  ;;  %v684_v10 = vmul.f32 %v520_v54, %v520_v54  ;;  %v650_v30 = vand.u32 2147483648, %v1244_v46 }
  0xfc   : > { %v1251_v56 = vadd.f32 %v630_v53, %v624_v52  ;;  %v1042_v57 = vpop.f32.mrb[8].mxu0  ;;  %1096 = vrsqrt.f32 %v1238_v35  ;;  %vm642_vm7 = vcmp.eq.f32.partialorder %v1242_v45, 0.0  ;;  %vm649_vm8 = vcmp.eq.f32.partialorder %v1244_v46, 0.0 }
  0xfd   : > { %v524_v58 = vpop.f32.mrb[8].mxu1  ;;  %v601_v59 = vpop.f32.mrb[9].mxu0  ;;  %1098 = vrsqrt.f32 %v1248_v55  ;;  %v685_v7 = vmul.f32 %v1042_v57, %v1042_v57  ;;  %vm661_vm9 = vcmp.eq.f32.partialorder %v1248_v55, inf  ;;  %vm663_vm10 = vcmp.eq.f32.partialorder %v1248_v55, 0.0 }
  0xfe   : > { %v686_v61 = vmul.f32 %v524_v58, %v524_v58  ;;  %v526_v62 = vpop.f32.mrb[9].mxu1  ;;  %1100 = vrsqrt.f32 %v1251_v56  ;;  %v682_v13 = vmul.f32 %v601_v59, %v601_v59  ;;  %v664_v39 = vand.u32 2147483648, %v1248_v55 }
  0xff   : > { %v687_v0 = vmul.f32 %v526_v62, %v526_v62  ;;  %vm668_vm11 = vcmp.eq.f32.partialorder %v1251_v56, inf  ;;  %vm670_vm12 = vcmp.eq.f32.partialorder %v1251_v56, 0.0 }
 0x100   : > { %v1256_v1 = vadd.f32 %v686_v61, %v680_v60  ;;  %v1045_v2 = vpop.f32.mrb[10].mxu0 }
 0x101   : > { %v1258_v3 = vadd.f32 %v687_v0, %v681_v63  ;;  %v530_v4 = vpop.f32.mrb[10].mxu1  ;;  %v691_v5 = vmul.f32 %v1045_v2, %v1045_v2  ;;  %v611_v6 = vpop.f32.mrb[11].mxu0 }
 0x102   : > { %v532_v8 = vpop.f32.mrb[11].mxu1  ;;  %v689_v11 = vmul.f32 %v530_v4, %v530_v4  ;;  %v688_v16 = vmul.f32 %v611_v6, %v611_v6  ;;  %1102 = vrsqrt.f32 %v1256_v1  ;;  %vm700_vm13 = vcmp.eq.f32.partialorder %v1256_v1, inf }
 0x103   : > { %v1091_v12 = vpop.eup %1090  ;;  %v1260_v14 = vadd.f32 %v691_v5, %v685_v7  ;;  %v690_v15 = vmul.f32 %v532_v8, %v532_v8  ;;  %1104 = vrsqrt.f32 %v1258_v3  ;;  %v703_v48 = vand.u32 2147483648, %v1256_v1 }
 0x104   : > { %v1093_v17 = vpop.eup %1092  ;;  %v1263_v18 = vadd.f32 %v689_v11, %v683_v9  ;;  %v1268_v21 = vadd.f32 %v688_v16, %v682_v13  ;;  %v639_v23 = vmul.f32 %v1091_v12, %v1242_v45  ;;  %vm707_vm14 = vcmp.eq.f32.partialorder %v1258_v3, inf }
 0x105   : > { %v1095_v19 = vpop.eup %1094  ;;  %v1266_v20 = vadd.f32 %v690_v15, %v684_v10  ;;  %1106 = vrsqrt.f32 %v1260_v14  ;;  %v646_v26 = vmul.f32 %v1093_v17, %v1244_v46  ;;  %v710_v49 = vand.u32 2147483648, %v1258_v3 }
 0x106   : > { %v1097_v22 = vpop.eup %1096  ;;  %v653_v27 = vmul.f32 %v1095_v19, %v1240_v38  ;;  %1108 = vrsqrt.f32 %v1268_v21  ;;  %v641_v33 = vsel %vm640_vm5, %v1242_v45, %v639_v23  ;;  %vm714_vm15 = vcmp.eq.f32.partialorder %v1268_v21, inf }
 0x107   : > { %v1099_v24 = vpop.eup %1098  ;;  %1110 = vrsqrt.f32 %v1263_v18  ;;  %v674_v31 = vmul.f32 %v1097_v22, %v1238_v35  ;;  %v648_v34 = vsel %vm647_vm6, %v1244_v46, %v646_v26  ;;  %v1300_v41 = vsel %vm642_vm7, %v643_v28, %v641_v33 }
 0x108   : > { %v1101_v29 = vpop.eup %1100  ;;  %v660_v32 = vmul.f32 %v1099_v24, %v1248_v55  ;;  %1112 = vrsqrt.f32 %v1266_v20  ;;  %v655_v37 = vsel %vm654_vm1, %v1240_v38, %v653_v27  ;;  %v1308_v44 = vsel %vm649_vm8, %v650_v30, %v648_v34 }
 0x109   : > { %v667_v40 = vmul.f32 %v1101_v29, %v1251_v56  ;;  %v676_v42 = vsel %vm675_vm2, %v1238_v35, %v674_v31  ;;  %v671_v46 = vand.u32 2147483648, %v1251_v56  ;;  %v1317_v50 = vsel %vm656_vm3, %v657_v25, %v655_v37 }
 0x10a   : > { %v662_v45 = vsel %vm661_vm9, %v1248_v55, %v660_v32  ;;  %v717_v52 = vand.u32 2147483648, %v1268_v21  ;;  %v1326_v54 = vsel %vm677_vm4, %v678_v36, %v676_v42  ;;  %v746_v57 = vadd.f32 1.0, %v1300_v41 }
 0x10b   : > { %v669_v53 = vsel %vm668_vm11, %v1251_v56, %v667_v40  ;;  %v1331_v38 = vsel %vm663_vm10, %v664_v39, %v662_v45  ;;  %vm702_vm0 = vcmp.eq.f32.partialorder %v1256_v1, 0.0  ;;  %vm709_vm1 = vcmp.eq.f32.partialorder %v1258_v3, 0.0 }
 0x10c   : > { %v1103_v43 = vpop.eup %1102  ;;  %v755_v58 = vadd.f32 1.0, %v1308_v44  ;;  %vm721_vm2 = vcmp.eq.f32.partialorder %v1263_v18, inf  ;;  %v749_v35 = vmul.f32 -0.5, %v1300_v41  ;;  %v1342_v55 = vsel %vm670_vm12, %v671_v46, %v669_v53 }
 0x10d   : > { %v1105_v47 = vpop.eup %1104  ;;  %v699_v60 = vmul.f32 %v1103_v43, %v1256_v1  ;;  %vm716_vm3 = vcmp.eq.f32.partialorder %v1268_v21, 0.0  ;;  %v724_v63 = vand.u32 2147483648, %v1263_v18  ;;  %v758_v2 = vmul.f32 -0.5, %v1308_v44 }
 0x10e   : > { %v706_v61 = vmul.f32 %v1105_v47, %v1258_v3  ;;  %vm723_vm4 = vcmp.eq.f32.partialorder %v1263_v18, 0.0  ;;  %vm728_vm5 = vcmp.eq.f32.partialorder %v1266_v20, inf  ;;  %v731_v5 = vand.u32 2147483648, %v1266_v20 }
 0x10f   : > { %v1107_v51 = vpop.eup %1106  ;;  %1114 = vlog2.f32 %v746_v57  ;;  %v764_v56 = vadd.f32 1.0, %v1317_v50  ;;  %vm730_vm6 = vcmp.eq.f32.partialorder %v1266_v20, 0.0  ;;  %vm735_vm7 = vcmp.eq.f32.partialorder %v1260_v14, inf }
 0x110   : > { %v1109_v59 = vpop.eup %1108  ;;  %v734_v0 = vmul.f32 %v1107_v51, %v1260_v14  ;;  %vm737_vm8 = vcmp.eq.f32.partialorder %v1260_v14, 0.0  ;;  %1116 = vlog2.f32 %v755_v58  ;;  %v701_v8 = vsel %vm700_vm13, %v1256_v1, %v699_v60 }
 0x111   : > { %v1111_v62 = vpop.eup %1110  ;;  %v713_v6 = vmul.f32 %v1109_v59, %v1268_v21  ;;  %v708_v9 = vsel %vm707_vm14, %v1258_v3, %v706_v61  ;;  %v750_v10 = vadd.f32 1.0, %v749_v35  ;;  %v759_v13 = vadd.f32 1.0, %v758_v2 }
 0x112   : > { %v1113_v4 = vpop.eup %1112  ;;  %v720_v7 = vmul.f32 %v1111_v62, %v1263_v18  ;;  %v736_v12 = vsel %vm735_vm7, %v1260_v14, %v734_v0  ;;  %v767_v15 = vmul.f32 -0.5, %v1317_v50  ;;  %v738_v16 = vand.u32 2147483648, %v1260_v14 }
 0x113   : > { %v727_v11 = vmul.f32 %v1113_v4, %v1266_v20  ;;  %v752_v17 = vand.u32 2147483647, %v1300_v41  ;;  %1118 = vlog2.f32 %v764_v56  ;;  %v773_v19 = vadd.f32 1.0, %v1331_v38 }
 0x114   : > { %v1371_v22 = vsel %vm702_vm0, %v703_v48, %v701_v8  ;;  %v1375_v23 = vsel %vm709_vm1, %v710_v49, %v708_v9  ;;  %v715_v24 = vsel %vm714_vm15, %v1268_v21, %v713_v6  ;;  %v782_v25 = vadd.f32 1.0, %v1342_v55 }
 0x115   : > { %v722_v26 = vsel %vm721_vm2, %v1263_v18, %v720_v7  ;;  %v1386_v27 = vsel %vm737_vm8, %v738_v16, %v736_v12  ;;  %v1389_v1 = vmul.f32 %v750_v10, %v1300_v41  ;;  %v761_v3 = vand.u32 2147483647, %v1308_v44 }
 0x116   : > { %v729_v28 = vsel %vm728_vm5, %v1266_v20, %v727_v11  ;;  %v1396_v29 = vmul.f32 %v759_v13, %v1308_v44  ;;  %v768_v30 = vadd.f32 1.0, %v767_v15  ;;  %v770_v31 = vand.u32 2147483647, %v1317_v50 }
 0x117   : > { %v1401_v14 = vsel %vm716_vm3, %v717_v52, %v715_v24  ;;  %1120 = vlog2.f32 %v773_v19  ;;  %v776_v32 = vmul.f32 -0.5, %v1331_v38  ;;  %v800_v33 = vadd.f32 1.0, %v1371_v22 }
 0x118   : > { %v1407_v34 = vsel %vm723_vm4, %v724_v63, %v722_v26  ;;  %vm1409_vm9 = vcmp.lt.f32.partialorder %v752_v17, 0.0004427343  ;;  %1122 = vlog2.f32 %v782_v25  ;;  %v785_v37 = vmul.f32 -0.5, %v1342_v55 }
 0x119   : > { %v809_v21 = vadd.f32 1.0, %v1375_v23  ;;  %v1115_v39 = vpop.eup %1114  ;;  %v1417_v40 = vsel %vm730_vm6, %v731_v5, %v729_v28  ;;  %vm1419_vm10 = vcmp.lt.f32.partialorder %v761_v3, 0.0004427343  ;;  %v791_v18 = vadd.f32 1.0, %v1326_v54 }
 0x11a   : > { %1124 = vlog2.f32 %v800_v33  ;;  %v1117_v42 = vpop.eup %1116  ;;  %v1425_v43 = vmul.f32 %v768_v30, %v1317_v50  ;;  %v779_v44 = vand.u32 2147483647, %v1331_v38  ;;  %v818_v45 = vadd.f32 1.0, %v1401_v14 }
 0x11b   : > { %1126 = vlog2.f32 %v809_v21  ;;  %vm1429_vm11 = vcmp.lt.f32.partialorder %v770_v31, 0.0004427343  ;;  %v777_v46 = vadd.f32 1.0, %v776_v32  ;;  %v788_v47 = vand.u32 2147483647, %v1342_v55 }
 0x11c   : > { %v803_v48 = vmul.f32 -0.5, %v1371_v22  ;;  %v786_v49 = vadd.f32 1.0, %v785_v37  ;;  %v794_v51 = vmul.f32 -0.5, %v1326_v54  ;;  %1128 = vlog2.f32 %v818_v45 }
 0x11d   : > { %v827_v50 = vadd.f32 1.0, %v1407_v34  ;;  %v1119_v52 = vpop.eup %1118  ;;  %v748_v53 = vmul.f32 0.6931472, %v1115_v39  ;;  %v757_v57 = vmul.f32 0.6931472, %v1117_v42  ;;  %1130 = vlog2.f32 %v791_v18 }
 0x11e   : > { %v812_v58 = vmul.f32 -0.5, %v1375_v23  ;;  %v806_v59 = vand.u32 2147483647, %v1371_v22  ;;  %v821_v60 = vmul.f32 -0.5, %v1401_v14  ;;  %v836_v61 = vadd.f32 1.0, %v1417_v40 }
 0x11f   : > { %1132 = vlog2.f32 %v827_v50  ;;  %v1442_v35 = vmul.f32 %v777_v46, %v1331_v38  ;;  %v797_v62 = vand.u32 2147483647, %v1326_v54  ;;  %v804_v63 = vadd.f32 1.0, %v803_v48 }
 0x120   : > { %v815_v0 = vand.u32 2147483647, %v1375_v23  ;;  %v766_v2 = vmul.f32 0.6931472, %v1119_v52  ;;  %v1447_v4 = vmul.f32 %v786_v49, %v1342_v55  ;;  %v830_v5 = vmul.f32 -0.5, %v1407_v34 }
 0x121   : > { %1134 = vlog2.f32 %v836_v61  ;;  %v1121_v56 = vpop.eup %1120  ;;  %v754_v6 = vsel %vm1409_vm9, %v1389_v1, %v748_v53  ;;  %vm1453_vm12 = vcmp.lt.f32.partialorder %v779_v44, 0.0004427343  ;;  %v795_v7 = vadd.f32 1.0, %v794_v51 }
 0x122   : > { %v813_v8 = vadd.f32 1.0, %v812_v58  ;;  %v845_v9 = vadd.f32 1.0, %v1386_v27  ;;  %v1123_v10 = vpop.eup %1122  ;;  %v763_v55 = vsel %vm1419_vm10, %v1396_v29, %v757_v57  ;;  %vm1461_vm13 = vcmp.lt.f32.partialorder %v806_v59, 0.0004427343 }
 0x123   : > { %v822_v12 = vadd.f32 1.0, %v821_v60  ;;  %v824_v13 = vand.u32 2147483647, %v1401_v14  ;;  %v805_v16 = vmul.f32 %v804_v63, %v1371_v22  ;;  %vm1467_vm14 = vcmp.lt.f32.partialorder %v815_v0, 0.0004427343 }
 0x124   : > { %v1125_v15 = vpop.eup %1124  ;;  %v839_v19 = vmul.f32 -0.5, %v1417_v40  ;;  %1136 = vlog2.f32 %v845_v9  ;;  %v772_v25 = vsel %vm1429_vm11, %v1425_v43, %v766_v2  ;;  %vm1475_vm15 = vcmp.lt.f32.partialorder %v788_v47, 0.0004427343 }
 0x125   : > { %v1127_v24 = vpop.eup %1126  ;;  %v802_v1 = vmul.f32 0.6931472, %v1125_v15  ;;  %v831_v3 = vadd.f32 1.0, %v830_v5  ;;  %v833_v22 = vand.u32 2147483647, %v1407_v34  ;;  %v814_v30 = vmul.f32 %v813_v8, %v1375_v23 }
 0x126   : > { %v775_v28 = vmul.f32 0.6931472, %v1121_v56  ;;  %v811_v29 = vmul.f32 0.6931472, %v1127_v24  ;;  %v848_v31 = vmul.f32 -0.5, %v1386_v27  ;;  %v1129_v32 = vpop.eup %1128  ;;  %v823_v37 = vmul.f32 %v822_v12, %v1401_v14 }
 0x127   : > { %v784_v33 = vmul.f32 0.6931472, %v1123_v10  ;;  %v808_v36 = vsel %vm1461_vm13, %v805_v16, %v802_v1  ;;  %vm1485_vm0 = vcmp.lt.f32.partialorder %v824_v13, 0.0004427343  ;;  %v1131_v39 = vpop.eup %1130  ;;  %v820_v18 = vmul.f32 0.6931472, %v1129_v32 }
 0x128   : > { %v817_v41 = vsel %vm1467_vm14, %v814_v30, %v811_v29  ;;  %v840_v42 = vadd.f32 1.0, %v839_v19  ;;  %v854_v23 = vsub.f32 %v754_v6, %v808_v36  ;;  %v832_v44 = vmul.f32 %v831_v3, %v1407_v34 }
 0x129   : > { %v1133_v43 = vpop.eup %1132  ;;  %vm1492_vm1 = vcmp.lt.f32.partialorder %v833_v22, 0.0004427343  ;;  %v842_v14 = vand.u32 2147483647, %v1417_v40  ;;  %v855_v20 = vsub.f32 %v763_v55, %v817_v41  ;;  %v826_v46 = vsel %vm1485_vm0, %v823_v37, %v820_v18 }
 0x12a   : > { %v829_v47 = vmul.f32 0.6931472, %v1133_v43  ;;  %v849_v48 = vadd.f32 1.0, %v848_v31  ;;  %v860_v49 = vand.u32 2147483647, %v854_v23  ;;  %v781_v50 = vsel %vm1453_vm12, %v1442_v35, %v775_v28 }
 0x12b   : > { %v1135_v51 = vpop.eup %1134  ;;  %v793_v52 = vmul.f32 0.6931472, %v1131_v39  ;;  %v856_v34 = vsub.f32 %v772_v25, %v826_v46  ;;  %v861_v53 = vand.u32 2147483647, %v855_v20  ;;  %v841_v59 = vmul.f32 %v840_v42, %v1417_v40 }
 0x12c   : > { %v835_v57 = vsel %vm1492_vm1, %v832_v44, %v829_v47  ;;  %v838_v58 = vmul.f32 0.6931472, %v1135_v51  ;;  %v851_v60 = vand.u32 2147483647, %v1386_v27  ;;  %vm843_vm2 = vcmp.lt.f32.partialorder %v842_v14, 0.0004427343 }
 0x12d   : > { %v857_v61 = vsub.f32 %v781_v50, %v835_v57  ;;  %v862_v63 = vand.u32 2147483647, %v856_v34  ;;  %v887_v0 = vadd.f32 %v861_v53, %v860_v49  ;;  %v790_v35 = vsel %vm1475_vm15, %v1447_v4, %v784_v33 }
 0x12e   : > { %v1137_v2 = vpop.eup %1136  ;;  %v796_v5 = vmul.f32 %v795_v7, %v1326_v54  ;;  %v844_v56 = vsel %vm843_vm2, %v841_v59, %v838_v58  ;;  %v850_v6 = vmul.f32 %v849_v48, %v1386_v27  ;;  %vm798_vm3 = vcmp.lt.f32.partialorder %v797_v62, 0.0004427343 }
 0x12f   : > { %v847_v38 = vmul.f32 0.6931472, %v1137_v2  ;;  %v858_v8 = vsub.f32 %v790_v35, %v844_v56  ;;  %v863_v9 = vand.u32 2147483647, %v857_v61  ;;  %v888_v40 = vadd.f32 %v887_v0, %v862_v63 }
 0x130   : > { %vm852_vm4 = vcmp.lt.f32.partialorder %v851_v60, 0.0004427343  ;;  %v799_v10 = vsel %vm798_vm3, %v796_v5, %v793_v52 }
 0x131   : > { %v853_v55 = vsel %vm852_vm4, %v850_v6, %v847_v38  ;;  %v864_v11 = vand.u32 2147483647, %v858_v8  ;;  %v889_v12 = vadd.f32 %v888_v40, %v863_v9 }
 0x132   : > { %v859_v13 = vsub.f32 %v799_v10, %v853_v55 }
 0x133   : > { %v890_v4 = vadd.f32 %v889_v12, %v864_v11 }
 0x134   : > { %v865_v15 = vand.u32 2147483647, %v859_v13 }
 0x136   : > { %v891_v7 = vadd.f32 %v890_v4, %v865_v15 }
 0x138   : > { %892 = vadd.xlane.f32.xlu0 %v891_v7 }
 0x1c5   : > { %v893_v16 = vpop.xlane.xlu0 %892 }
 0x1c6   : > { %v894_v27 = vrot.slane %v893_v16, 4 }
 0x1c8   : > { %v895_v17 = vadd.f32 %v894_v27, %v893_v16 }
 0x1ca   : > { %v896_v19 = vrot.slane %v895_v17, 2 }
 0x1cc   : > { %v897_v24 = vadd.f32 %v896_v19, %v895_v17 }
 0x1ce   : > { %v898_v25 = vrot.slane %v897_v24, 1 }
 0x1d0   : > { %v899_v26 = vadd.f32 %v898_v25, %v897_v24 }
 0x1d2   : > { %1063 = vpush %v899_v26 }
 0x203   : > { %s1064_s8 = spop %1063 }
 0x204   : > { %v901_v54 = vstv %s1064_s8 }
 0x205   : > { %902 = vst [vmem:[%s232_s7] sm:$0xff] %v901_v54 }
 0x206 PF: > { %s13_s14 = sadd.s32 1, %s1160_s14   ;;  %s1548_s12 = smov %s1156_s13 }
 0x207   : > { %p10_p5 = scmp.ge.s32.totalorder %s13_s14, 4   ;;  %s1549_s13 = smov %s1551_s15 }
 0x209   :  { %12 = sbr.rel (!%p10_p5) target bundleno = 2 (0x2), region = 73 }

// kernel: multiscale_spectral_loss.4
= control target key start
LH: loop header
LB: loop body
LE: loop exit
PB: predicated region body
PF: predicated region fallthrough
CT: control target
= control target key end

     0   :  { %s1193_s12 = smov 0   ;;  %s1195_s13 = smov 0   ;;  %s1449_s0 = inlined_call_operand.vmem [shape: f32[2,8,640], index: 0, kind: input, shape index: {}]   ;;  %s1450_s1 = inlined_call_operand.vmem [shape: f32[2,8,640], index: 1, kind: input, shape index: {}]   ;;  %s1451_s2 = inlined_call_operand.vmem [shape: f32[16,8], index: 2, kind: input, shape index: {}]   ;;  %s1452_s3 = inlined_call_operand.vmem [shape: f32[2,8,128], index: 3, kind: output, shape index: {}]  }
   0x1   :  { %s1197_s14 = smov 0  }
   0x2 LB: > { %s25_s15 = sadd.s32 1, %s1166_s13  ;;  %p1046_p0 = scmp.ge.s32.totalorder %s1170_s14, 1  ;;  %s1170_s14 = sphi %s1197_s14, %s13_s14   ;;  %s1166_s13 = sphi %s1195_s13, %s1464_s13   ;;  %s1162_s12 = sphi %s1193_s12, %s1463_s12  }
   0x3   : > { %p27_p1 = scmp.ge.s32.totalorder %s25_s15, 2  ;;  %p173_p2 = scmp.lt.s32.totalorder %s1170_s14, 3 }
   0x5   : > { %s1466_s15 = smov (%p27_p1, %s25_s15), 0  ;;  %p174_p3 = pnand %p1046_p0, %p173_p2 }
   0x6   : > { %p210_p4 = scmp.lt.s32.totalorder (!%p174_p3), %s1162_s12, 1  ;;  %v1172_v0 = vmov (!%p174_p3), 0.0   ;;  %v252_v1 = vld [vmem:[%s1451_s2] sm:$0xff] (!%p174_p3)  ;;  %vm254_vm0 = vcmask (!%p174_p3), 64512   ;;  %v253_v9 = vld [vmem:[%s1451_s2 + $0x8] sm:$0xff] (!%p174_p3) }
   0x7   : > { %177 = sbr.rel (%p174_p3) target bundleno = 501 (0x1f5), region = 32  ;;  %325 = vmatprep.mubr.f32.mxu0 (!%p174_p3), %v1172_v0  ;;  %402 = vmatprep.mubr.f32.mxu1 (!%p174_p3), %v1172_v0 }
   0xe   : > { %s1468_s12 = smov (!%p210_p4, %s1162_s12), 1 }
   0xf   : > { %s1080_s16 = smul.u32 40, %s1468_s12  ;;  %s1049_s27 = sshll.u32 %s1468_s12, 3 }
  0x10   : > { %s232_s30 = scalar_lea.vmem %s1452_s3, %s1049_s27 }
  0x11   : > { %s217_s19 = scalar_lea.vmem %s1449_s0, %s1080_s16  ;;  %s227_s24 = scalar_lea.vmem %s1450_s1, %s1080_s16 }
  0x12   : > { %v243_v2 = vld [vmem:[%s217_s19 + $0x8] sm:$0xff]  ;;  %v245_v3 = vld [vmem:[%s217_s19 + $0x18] sm:$0xff]  ;;  %v242_v4 = vld [vmem:[%s217_s19] sm:$0xff] }
  0x13   : > { %261 = vmatprep.subr.mxu0 %v243_v2  ;;  %338 = vmatprep.subr.mxu1 %v245_v3  ;;  %v244_v5 = vld [vmem:[%s217_s19 + $0x10] sm:$0xff]  ;;  %v246_v6 = vld [vmem:[%s217_s19 + $0x20] sm:$0xff]  ;;  %v248_v7 = vld [vmem:[%s227_s24 + $0x8] sm:$0xff] }
  0x14   : > { %262 = vmatpush1.msra.mxu0 %v242_v4  ;;  %339 = vmatpush1.msra.mxu1 %v244_v5  ;;  %v247_v8 = vld [vmem:[%s227_s24] sm:$0xff]  ;;  %v250_v10 = vld [vmem:[%s227_s24 + $0x18] sm:$0xff]  ;;  %v249_v12 = vld [vmem:[%s227_s24 + $0x10] sm:$0xff] }
  0x15   : > { %1050 = vmatmul.mubr.msk.f32.vlgmr.msra.gmra.mrb[0].mxu0 %vm254_vm0, %v252_v1  ;;  %1052 = vmatmul.mubr.msk.f32.vlgmr.msra.gmra.mrb[0].mxu1 %vm254_vm0, %v252_v1  ;;  %v251_v11 = vld [vmem:[%s227_s24 + $0x20] sm:$0xff] }
  0x16   : > { %1070 = vmatprep.subr.mxu0 %v246_v6  ;;  %490 = vmatprep.subr.mxu1 %v248_v7 }
  0x17   : > { %1071 = vmatpush3.msra.mxu0 %v246_v6  ;;  %491 = vmatpush1.msra.mxu1 %v247_v8 }
  0x18   : > { %331 = vmatprep.mubr.f32.mxu0 %v1172_v0  ;;  %408 = vmatprep.mubr.f32.mxu1 %v1172_v0 }
  0x19   : > { %1051 = vmatmul.mubr.msk.f32.gmra.mrb[2].mxu0 %vm254_vm0, %v253_v9  ;;  %1053 = vmatmul.mubr.msk.f32.gmra.mrb[2].mxu1 %vm254_vm0, %v253_v9 }
  0x1a   : > { %1072 = vmatprep.mubr.msk.f32.mxu0 %vm254_vm0, %v252_v1  ;;  %554 = vmatprep.mubr.f32.mxu1 %v1172_v0 }
  0x1b   : > { %567 = vmatprep.subr.mxu0 %v250_v10  ;;  %1075 = vmatprep.subr.mxu1 %v251_v11 }
  0x1d   : > { %1073 = vmatmul.mubr.msk.f32.vlgmr.msra.gmra.mrb[4].mxu0 %vm254_vm0, %v253_v9  ;;  %1056 = vmatmul.mubr.msk.f32.vlgmr.msra.gmra.mrb[4].mxu1 %vm254_vm0, %v252_v1 }
  0x1e   : > { %568 = vmatpush1.msra.mxu0 %v249_v12  ;;  %560 = vmatprep.mubr.f32.mxu1 %v1172_v0 }
  0x1f   : > { %631 = vmatprep.mubr.f32.mxu0 %v1172_v0  ;;  %1076 = vmatpush3.msra.mxu1 %v251_v11 }
  0x21   : > { %1057 = vmatmul.mubr.msk.f32.gmra.mrb[6].mxu1 %vm254_vm0, %v253_v9  ;;  %1058 = vmatmul.mubr.msk.f32.vlgmr.msra.gmra.mrb[6].mxu0 %vm254_vm0, %v252_v1 }
  0x22   : > { %637 = vmatprep.mubr.f32.mxu0 %v1172_v0  ;;  %1077 = vmatprep.mubr.msk.f32.mxu1 %vm254_vm0, %v252_v1 }
  0x25   : > { %1059 = vmatmul.mubr.msk.f32.gmra.mrb[8].mxu0 %vm254_vm0, %v253_v9  ;;  %1078 = vmatmul.mubr.msk.f32.vlgmr.msra.gmra.mrb[8].mxu1 %vm254_vm0, %v253_v9 }
  0xe8   : > { %v327_v13 = vpop.f32.mrb[0].mxu0  ;;  %v404_v14 = vpop.f32.mrb[0].mxu1 }
  0xe9   : > { %v329_v15 = vpop.f32.mrb[1].mxu0  ;;  %v406_v16 = vpop.f32.mrb[1].mxu1  ;;  %v719_v19 = vmul.f32 %v327_v13, %v327_v13  ;;  %v721_v20 = vmul.f32 %v404_v14, %v404_v14 }
  0xea   : > { %v720_v25 = vmul.f32 %v329_v15, %v329_v15  ;;  %v722_v26 = vmul.f32 %v406_v16, %v406_v16 }
  0xec   : > { %v333_v17 = vpop.f32.mrb[2].mxu0  ;;  %v410_v18 = vpop.f32.mrb[2].mxu1 }
  0xed   : > { %v724_v21 = vmul.f32 %v333_v17, %v333_v17  ;;  %v726_v22 = vmul.f32 %v410_v18, %v410_v18  ;;  %v335_v23 = vpop.f32.mrb[3].mxu0  ;;  %v412_v24 = vpop.f32.mrb[3].mxu1 }
  0xee   : > { %v725_v27 = vmul.f32 %v335_v23, %v335_v23  ;;  %v727_v28 = vmul.f32 %v412_v24, %v412_v24 }
  0xef   : > { %v1238_v29 = vadd.f32 %v724_v21, %v719_v19  ;;  %v1240_v30 = vadd.f32 %v726_v22, %v721_v20 }
  0xf0   : > { %v1242_v31 = vadd.f32 %v725_v27, %v720_v25  ;;  %v1244_v32 = vadd.f32 %v727_v28, %v722_v26  ;;  %v1074_v33 = vpop.f32.mrb[4].mxu0  ;;  %v556_v34 = vpop.f32.mrb[4].mxu1 }
  0xf1   : > { %1108 = vrsqrt.f32 %v1238_v29  ;;  %v728_v35 = vmul.f32 %v1074_v33, %v1074_v33  ;;  %v481_v36 = vpop.f32.mrb[5].mxu0  ;;  %v558_v37 = vpop.f32.mrb[5].mxu1  ;;  %v769_v42 = vmul.f32 %v556_v34, %v556_v34  ;;  %vm736_vm1 = vcmp.eq.f32.partialorder %v1238_v29, inf }
  0xf2   : > { %v723_v38 = vmul.f32 %v481_v36, %v481_v36  ;;  %1110 = vrsqrt.f32 %v1242_v31  ;;  %v770_v46 = vmul.f32 %v558_v37, %v558_v37  ;;  %v739_v4 = vand.u32 2147483648, %v1238_v29 }
  0xf3   : > { %1112 = vrsqrt.f32 %v1240_v30  ;;  %vm743_vm2 = vcmp.eq.f32.partialorder %v1242_v31, inf  ;;  %v746_v6 = vand.u32 2147483648, %v1242_v31  ;;  %vm738_vm3 = vcmp.eq.f32.partialorder %v1238_v29, 0.0 }
  0xf4   : > { %v1248_v39 = vadd.f32 %v728_v35, %v723_v38  ;;  %v562_v40 = vpop.f32.mrb[6].mxu1  ;;  %v633_v41 = vpop.f32.mrb[6].mxu0  ;;  %1114 = vrsqrt.f32 %v1244_v32  ;;  %vm745_vm4 = vcmp.eq.f32.partialorder %v1242_v31, 0.0  ;;  %vm750_vm5 = vcmp.eq.f32.partialorder %v1240_v30, inf }
  0xf5   : > { %v774_v43 = vmul.f32 %v562_v40, %v562_v40  ;;  %v564_v44 = vpop.f32.mrb[7].mxu1  ;;  %v635_v45 = vpop.f32.mrb[7].mxu0  ;;  %v771_v52 = vmul.f32 %v633_v41, %v633_v41  ;;  %vm752_vm6 = vcmp.eq.f32.partialorder %v1240_v30, 0.0  ;;  %v753_v12 = vand.u32 2147483648, %v1240_v30 }
  0xf6   : > { %v775_v47 = vmul.f32 %v564_v44, %v564_v44  ;;  %1116 = vrsqrt.f32 %v1248_v39  ;;  %v772_v58 = vmul.f32 %v635_v45, %v635_v45  ;;  %vm757_vm7 = vcmp.eq.f32.partialorder %v1244_v32, inf }
  0xf7   : > { %v1252_v48 = vadd.f32 %v774_v43, %v769_v42  ;;  %vm759_vm8 = vcmp.eq.f32.partialorder %v1244_v32, 0.0  ;;  %v760_v15 = vand.u32 2147483648, %v1244_v32  ;;  %vm764_vm9 = vcmp.eq.f32.partialorder %v1248_v39, inf }
  0xf8   : > { %v1255_v49 = vadd.f32 %v775_v47, %v770_v46  ;;  %v639_v50 = vpop.f32.mrb[8].mxu0  ;;  %v1079_v51 = vpop.f32.mrb[8].mxu1  ;;  %vm766_vm10 = vcmp.eq.f32.partialorder %v1248_v39, 0.0  ;;  %v767_v18 = vand.u32 2147483648, %v1248_v39 }
  0xf9   : > { %1118 = vrsqrt.f32 %v1252_v48  ;;  %v776_v53 = vmul.f32 %v639_v50, %v639_v50  ;;  %v641_v54 = vpop.f32.mrb[9].mxu0  ;;  %v710_v55 = vpop.f32.mrb[9].mxu1  ;;  %v778_v56 = vmul.f32 %v1079_v51, %v1079_v51  ;;  %vm786_vm11 = vcmp.eq.f32.partialorder %v1252_v48, inf }
  0xfa   : > { %1120 = vrsqrt.f32 %v1255_v49  ;;  %v777_v60 = vmul.f32 %v641_v54, %v641_v54  ;;  %v773_v61 = vmul.f32 %v710_v55, %v710_v55  ;;  %v789_v23 = vand.u32 2147483648, %v1252_v48 }
  0xfb   : > { %v1109_v57 = vpop.eup %1108  ;;  %v1259_v59 = vadd.f32 %v776_v53, %v771_v52  ;;  %vm793_vm12 = vcmp.eq.f32.partialorder %v1255_v49, inf  ;;  %v796_v25 = vand.u32 2147483648, %v1255_v49  ;;  %vm788_vm13 = vcmp.eq.f32.partialorder %v1252_v48, 0.0 }
  0xfc   : > { %v1111_v62 = vpop.eup %1110  ;;  %v1262_v63 = vadd.f32 %v777_v60, %v772_v58  ;;  %v1264_v0 = vadd.f32 %v778_v56, %v773_v61  ;;  %v735_v1 = vmul.f32 %v1109_v57, %v1238_v29  ;;  %vm795_vm14 = vcmp.eq.f32.partialorder %v1255_v49, 0.0 }
  0xfd   : > { %1122 = vrsqrt.f32 %v1259_v59  ;;  %v1113_v2 = vpop.eup %1112  ;;  %v742_v3 = vmul.f32 %v1111_v62, %v1242_v31  ;;  %vm800_vm15 = vcmp.eq.f32.partialorder %v1259_v59, inf  ;;  %vm802_vm0 = vcmp.eq.f32.partialorder %v1259_v59, 0.0 }
  0xfe   : > { %1124 = vrsqrt.f32 %v1262_v63  ;;  %v1115_v5 = vpop.eup %1114  ;;  %v749_v8 = vmul.f32 %v1113_v2, %v1240_v30  ;;  %v737_v9 = vsel %vm736_vm1, %v1238_v29, %v735_v1  ;;  %v803_v36 = vand.u32 2147483648, %v1259_v59 }
  0xff   : > { %1126 = vrsqrt.f32 %v1264_v0  ;;  %v744_v11 = vsel %vm743_vm2, %v1242_v31, %v742_v3  ;;  %v756_v14 = vmul.f32 %v1115_v5, %v1244_v32  ;;  %v1290_v17 = vsel %vm738_vm3, %v739_v4, %v737_v9 }
 0x100   : > { %v1117_v7 = vpop.eup %1116  ;;  %v1297_v19 = vsel %vm745_vm4, %v746_v6, %v744_v11  ;;  %v751_v20 = vsel %vm750_vm5, %v1240_v30, %v749_v8  ;;  %v824_v27 = vadd.f32 1.0, %v1290_v17  ;;  %vm807_vm1 = vcmp.eq.f32.partialorder %v1262_v63, inf }
 0x101   : > { %v763_v21 = vmul.f32 %v1117_v7, %v1248_v39  ;;  %v758_v26 = vsel %vm757_vm7, %v1244_v32, %v756_v14  ;;  %v1315_v29 = vsel %vm752_vm6, %v753_v12, %v751_v20  ;;  %v833_v33 = vadd.f32 1.0, %v1297_v19 }
 0x102   : > { %v1328_v30 = vsel %vm759_vm8, %v760_v15, %v758_v26  ;;  %1128 = vlog2.f32 %v824_v27  ;;  %v827_v42 = vmul.f32 -0.5, %v1290_v17  ;;  %v842_v43 = vadd.f32 1.0, %v1315_v29 }
 0x103   : > { %v1119_v10 = vpop.eup %1118  ;;  %v765_v35 = vsel %vm764_vm9, %v1248_v39, %v763_v21  ;;  %vm809_vm2 = vcmp.eq.f32.partialorder %v1262_v63, 0.0  ;;  %v810_v44 = vand.u32 2147483648, %v1262_v63  ;;  %1130 = vlog2.f32 %v833_v33 }
 0x104   : > { %v1121_v13 = vpop.eup %1120  ;;  %v785_v16 = vmul.f32 %v1119_v10, %v1252_v48  ;;  %v1343_v32 = vsel %vm766_vm10, %v767_v18, %v765_v35  ;;  %vm814_vm3 = vcmp.eq.f32.partialorder %v1264_v0, inf  ;;  %v830_v50 = vand.u32 2147483647, %v1290_v17 }
 0x105   : > { %v792_v24 = vmul.f32 %v1121_v13, %v1255_v49  ;;  %v828_v52 = vadd.f32 1.0, %v827_v42  ;;  %1132 = vlog2.f32 %v842_v43  ;;  %v845_v53 = vmul.f32 -0.5, %v1315_v29 }
 0x106   : > { %v787_v31 = vsel %vm786_vm11, %v1252_v48, %v785_v16  ;;  %v851_v48 = vadd.f32 1.0, %v1328_v30  ;;  %v860_v55 = vadd.f32 1.0, %v1343_v32  ;;  %v839_v60 = vand.u32 2147483647, %v1297_v19 }
 0x107   : > { %v1123_v22 = vpop.eup %1122  ;;  %v794_v38 = vsel %vm793_vm12, %v1255_v49, %v792_v24  ;;  %v1337_v41 = vsel %vm788_vm13, %v789_v23, %v787_v31  ;;  %v836_v49 = vmul.f32 -0.5, %v1297_v19  ;;  %vm816_vm4 = vcmp.eq.f32.partialorder %v1264_v0, 0.0 }
 0x108   : > { %v1125_v28 = vpop.eup %1124  ;;  %v799_v34 = vmul.f32 %v1123_v22, %v1259_v59  ;;  %v1349_v45 = vsel %vm795_vm14, %v796_v25, %v794_v38  ;;  %v869_v51 = vadd.f32 1.0, %v1337_v41  ;;  %v854_v61 = vmul.f32 -0.5, %v1328_v30 }
 0x109   : > { %v1127_v37 = vpop.eup %1126  ;;  %v806_v40 = vmul.f32 %v1125_v28, %v1262_v63  ;;  %v878_v56 = vadd.f32 1.0, %v1349_v45  ;;  %vm1377_vm5 = vcmp.lt.f32.partialorder %v830_v50, 0.0004427343  ;;  %v837_v1 = vadd.f32 1.0, %v836_v49 }
 0x10a   : > { %v801_v46 = vsel %vm800_vm15, %v1259_v59, %v799_v34  ;;  %v813_v47 = vmul.f32 %v1127_v37, %v1264_v0  ;;  %1134 = vlog2.f32 %v869_v51  ;;  %v817_v59 = vand.u32 2147483648, %v1264_v0 }
 0x10b   : > { %v808_v39 = vsel %vm807_vm1, %v1262_v63, %v806_v40  ;;  %v1364_v54 = vsel %vm802_vm0, %v803_v36, %v801_v46  ;;  %1136 = vlog2.f32 %v851_v48  ;;  %v848_v63 = vand.u32 2147483647, %v1315_v29 }
 0x10c   : > { %v1370_v57 = vsel %vm809_vm2, %v810_v44, %v808_v39  ;;  %v815_v58 = vsel %vm814_vm3, %v1264_v0, %v813_v47  ;;  %1138 = vlog2.f32 %v878_v56  ;;  %v872_v2 = vmul.f32 -0.5, %v1337_v41  ;;  %v1129_v6 = vpop.eup %1128 }
 0x10d   : > { %v887_v3 = vadd.f32 1.0, %v1364_v54  ;;  %v1384_v4 = vsel %vm816_vm4, %v817_v59, %v815_v58  ;;  %v846_v5 = vadd.f32 1.0, %v845_v53  ;;  %1140 = vlog2.f32 %v860_v55  ;;  %v1131_v10 = vpop.eup %1130 }
 0x10e   : > { %v896_v0 = vadd.f32 1.0, %v1370_v57  ;;  %v829_v7 = vmul.f32 %v828_v52, %v1290_v17  ;;  %vm1388_vm6 = vcmp.lt.f32.partialorder %v839_v60, 0.0004427343  ;;  %v881_v9 = vmul.f32 -0.5, %v1349_v45 }
 0x10f   : > { %1142 = vlog2.f32 %v887_v3  ;;  %v855_v11 = vadd.f32 1.0, %v854_v61  ;;  %v857_v12 = vand.u32 2147483647, %v1328_v30  ;;  %v863_v13 = vmul.f32 -0.5, %v1343_v32  ;;  %v1133_v23 = vpop.eup %1132 }
 0x110   : > { %1144 = vlog2.f32 %v896_v0  ;;  %v838_v14 = vmul.f32 %v837_v1, %v1297_v19  ;;  %v873_v15 = vadd.f32 1.0, %v872_v2  ;;  %v890_v16 = vmul.f32 -0.5, %v1364_v54 }
 0x111   : > { %v905_v17 = vadd.f32 1.0, %v1384_v4  ;;  %v826_v18 = vmul.f32 0.6931472, %v1129_v6  ;;  %v847_v20 = vmul.f32 %v846_v5, %v1315_v29  ;;  %vm1399_vm7 = vcmp.lt.f32.partialorder %v848_v63, 0.0004427343 }
 0x112   : > { %v875_v22 = vand.u32 2147483647, %v1337_v41  ;;  %v866_v24 = vand.u32 2147483647, %v1343_v32  ;;  %v882_v25 = vadd.f32 1.0, %v881_v9  ;;  %v899_v19 = vmul.f32 -0.5, %v1370_v57 }
 0x113   : > { %1146 = vlog2.f32 %v905_v17  ;;  %v835_v27 = vmul.f32 0.6931472, %v1131_v10  ;;  %v856_v28 = vmul.f32 %v855_v11, %v1328_v30  ;;  %vm1407_vm8 = vcmp.lt.f32.partialorder %v857_v12, 0.0004427343 }
 0x114   : > { %v1135_v26 = vpop.eup %1134  ;;  %v864_v29 = vadd.f32 1.0, %v863_v13  ;;  %v884_v33 = vand.u32 2147483647, %v1349_v45  ;;  %v874_v36 = vmul.f32 %v873_v15, %v1337_v41  ;;  %v891_v37 = vadd.f32 1.0, %v890_v16 }
 0x115   : > { %v1137_v34 = vpop.eup %1136  ;;  %v871_v35 = vmul.f32 0.6931472, %v1135_v26  ;;  %v893_v38 = vand.u32 2147483647, %v1364_v54  ;;  %v832_v42 = vsel %vm1377_vm5, %v829_v7, %v826_v18  ;;  %v844_v43 = vmul.f32 0.6931472, %v1133_v23 }
 0x116   : > { %v1139_v40 = vpop.eup %1138  ;;  %vm876_vm9 = vcmp.lt.f32.partialorder %v875_v22, 0.0004427343  ;;  %v908_v30 = vmul.f32 -0.5, %v1384_v4  ;;  %v883_v47 = vmul.f32 %v882_v25, %v1349_v45  ;;  %v900_v48 = vadd.f32 1.0, %v899_v19 }
 0x117   : > { %v877_v44 = vsel %vm876_vm9, %v874_v36, %v871_v35  ;;  %v880_v46 = vmul.f32 0.6931472, %v1139_v40  ;;  %v1141_v39 = vpop.eup %1140  ;;  %v841_v41 = vsel %vm1388_vm6, %v838_v14, %v835_v27  ;;  %vm885_vm10 = vcmp.lt.f32.partialorder %v884_v33, 0.0004427343 }
 0x118   : > { %v902_v50 = vand.u32 2147483647, %v1370_v57  ;;  %v914_v51 = vsub.f32 %v832_v42, %v877_v44  ;;  %v853_v49 = vmul.f32 0.6931472, %v1137_v34  ;;  %v892_v55 = vmul.f32 %v891_v37, %v1364_v54 }
 0x119   : > { %v1143_v52 = vpop.eup %1142  ;;  %v886_v53 = vsel %vm885_vm10, %v883_v47, %v880_v46  ;;  %vm1422_vm11 = vcmp.lt.f32.partialorder %v893_v38, 0.0004427343  ;;  %v909_v60 = vadd.f32 1.0, %v908_v30  ;;  %v850_v62 = vsel %vm1399_vm7, %v847_v20, %v844_v43 }
 0x11a   : > { %v1145_v58 = vpop.eup %1144  ;;  %v889_v45 = vmul.f32 0.6931472, %v1143_v52  ;;  %v915_v59 = vsub.f32 %v841_v41, %v886_v53  ;;  %v919_v61 = vand.u32 2147483647, %v914_v51  ;;  %v901_v63 = vmul.f32 %v900_v48, %v1370_v57 }
 0x11b   : > { %v898_v1 = vmul.f32 0.6931472, %v1145_v58  ;;  %v911_v2 = vand.u32 2147483647, %v1384_v4  ;;  %v862_v3 = vmul.f32 0.6931472, %v1141_v39  ;;  %v859_v6 = vsel %vm1407_vm8, %v856_v28, %v853_v49 }
 0x11c   : > { %v895_v54 = vsel %vm1422_vm11, %v892_v55, %v889_v45  ;;  %vm903_vm12 = vcmp.lt.f32.partialorder %v902_v50, 0.0004427343  ;;  %v920_v5 = vand.u32 2147483647, %v915_v59  ;;  %v865_v7 = vmul.f32 %v864_v29, %v1343_v32 }
 0x11d   : > { %v1147_v0 = vpop.eup %1146  ;;  %v904_v8 = vsel %vm903_vm12, %v901_v63, %v898_v1  ;;  %v916_v9 = vsub.f32 %v850_v62, %v895_v54  ;;  %v910_v11 = vmul.f32 %v909_v60, %v1384_v4  ;;  %vm867_vm13 = vcmp.lt.f32.partialorder %v866_v24, 0.0004427343 }
 0x11e   : > { %v907_v10 = vmul.f32 0.6931472, %v1147_v0  ;;  %v917_v57 = vsub.f32 %v859_v6, %v904_v8  ;;  %v942_v12 = vadd.f32 %v920_v5, %v919_v61  ;;  %vm912_vm14 = vcmp.lt.f32.partialorder %v911_v2, 0.0004427343 }
 0x11f   : > { %v921_v13 = vand.u32 2147483647, %v916_v9  ;;  %v868_v14 = vsel %vm867_vm13, %v865_v7, %v862_v3 }
 0x120   : > { %v913_v15 = vsel %vm912_vm14, %v910_v11, %v907_v10  ;;  %v922_v16 = vand.u32 2147483647, %v917_v57 }
 0x121   : > { %v918_v17 = vsub.f32 %v868_v14, %v913_v15  ;;  %v943_v18 = vadd.f32 %v942_v12, %v921_v13 }
 0x123   : > { %v923_v20 = vand.u32 2147483647, %v918_v17  ;;  %v944_v21 = vadd.f32 %v943_v18, %v922_v16 }
 0x125   : > { %v945_v22 = vadd.f32 %v944_v21, %v923_v20 }
 0x127   : > { %946 = vadd.xlane.f32.xlu0 %v945_v22 }
 0x1b4   : > { %v947_v32 = vpop.xlane.xlu0 %946 }
 0x1b5   : > { %v948_v23 = vrot.slane %v947_v32, 4 }
 0x1b7   : > { %v949_v25 = vadd.f32 %v948_v23, %v947_v32 }
 0x1b9   : > { %v950_v19 = vrot.slane %v949_v25, 2 }
 0x1bb   : > { %v951_v4 = vadd.f32 %v950_v19, %v949_v25 }
 0x1bd   : > { %v952_v26 = vrot.slane %v951_v4, 1 }
 0x1bf   : > { %v953_v27 = vadd.f32 %v952_v26, %v951_v4 }
 0x1c1   : > { %1081 = vpush %v953_v27 }
 0x1f2   : > { %s1082_s4 = spop %1081 }
 0x1f3   : > { %v955_v24 = vstv %s1082_s4 }
 0x1f4   : > { %956 = vst [vmem:[%s232_s30] sm:$0xff] %v955_v24 }
 0x1f5 PF: > { %s13_s14 = sadd.s32 1, %s1170_s14   ;;  %s1463_s12 = smov %s1166_s13 }
 0x1f6   : > { %p10_p5 = scmp.ge.s32.totalorder %s13_s14, 4   ;;  %s1464_s13 = smov %s1466_s15 }
 0x1f8   :  { %12 = sbr.rel (!%p10_p5) target bundleno = 2 (0x2), region = 73 }

</bundles_post_ra>
